<compile_context>
chip_gen: v7x
topology: tpu7x:2x2x1
jax: 0.10.0
libtpu: 0.0.40
codegen_flags: <defaults>
</compile_context>

<pallas_src>
import math
from collections import namedtuple
from functools import partial

import numpy as np
import jax
import jax.numpy as jnp
from jax.experimental import pallas as pl
from jax.experimental.pallas import tpu as pltpu

NUM_JOINTS_TOTAL = 24          # 23 body joints + root
NUM_BETAS = 10
NUM_POSE_BASIS = 9 * 23        # 207
LANE = 128
LANE_TILE_CAP = 2048           # per-tile lane width cap (v7x VMEM-safe, > roofline knee)

SMPL_PARENTS = np.array(
    [-1, 0, 0, 0, 1, 2, 3, 4, 5, 6, 7, 8, 9, 9, 9, 12, 13, 14, 16, 17, 18, 19, 20, 21],
    dtype=np.int64)

ModelOutput = namedtuple(
    'ModelOutput',
    ['vertices', 'joints', 'full_pose', 'betas', 'global_orient', 'body_pose',
     'expression', 'left_hand_pose', 'right_hand_pose', 'jaw_pose',
     'joint_transform', 'vertex_transform', 'v_posed', 'v_shaped'])


# ------------------------------------------------------------------
# Pallas kernels
# ------------------------------------------------------------------
def _pick_lane_tile(n, cap=LANE_TILE_CAP):
    """Largest multiple-of-128 divisor of n that is <= cap (n is padded to 128x)."""
    if n <= cap:
        return n
    t = (cap // LANE) * LANE
    while t >= LANE:
        if n % t == 0:
            return t
        t -= LANE
    return n


def _blend_kernel(betas_ref, pf_ref, vt_ref, sd_ref, pd_ref, vp_ref):
    # v_posed_flat = v_template + betas @ shapedirs2d + pose_feature @ posedirs
    # (B, FT) lane-dense, channel-major flat layout; pure map over tiles -> "parallel".
    vp_ref[...] = (vt_ref[...]
                   + jnp.dot(betas_ref[...], sd_ref[...],
                             preferred_element_type=jnp.float32)
                   + jnp.dot(pf_ref[...], pd_ref[...],
                             preferred_element_type=jnp.float32))


def blend_pose_shape(betas_bf16, pf_bf16, v_template_flat, shapedirs2d, posedirs):
    B, NB = betas_bf16.shape
    NP = pf_bf16.shape[1]
    FV = v_template_flat.shape[1]
    FT = _pick_lane_tile(FV)
    nt = FV // FT
    return pl.pallas_call(
        _blend_kernel,
        out_shape=jax.ShapeDtypeStruct((B, FV), jnp.float32),
        grid=(nt,),
        in_specs=[
            pl.BlockSpec((B, NB), lambda t: (0, 0)),
            pl.BlockSpec((B, NP), lambda t: (0, 0)),
            pl.BlockSpec((1, FT), lambda t: (0, t)),
            pl.BlockSpec((NB, FT), lambda t: (0, t)),
            pl.BlockSpec((NP, FT), lambda t: (0, t)),
        ],
        out_specs=pl.BlockSpec((B, FT), lambda t: (0, t)),
        compiler_params=pltpu.CompilerParams(
            dimension_semantics=("parallel",)),
    )(betas_bf16, pf_bf16, v_template_flat, shapedirs2d, posedirs)


def _skin_rows(t16, vp3):
    # Apply a (16, Vt) flattened 4x4-per-vertex transform to (3, Vt) channel-first
    # points; homogeneous 'ones' row dropped (translation column added directly).
    rows = []
    for s in range(3):
        rows.append(t16[4 * s + 0:4 * s + 1, :] * vp3[0:1, :]
                    + t16[4 * s + 1:4 * s + 2, :] * vp3[1:2, :]
                    + t16[4 * s + 2:4 * s + 3, :] * vp3[2:3, :]
                    + t16[4 * s + 3:4 * s + 4, :])
    return jnp.concatenate(rows, axis=0)        # one (3, Vt) slab store per batch


def _skin_kernel_min(a_ref, w_ref, vp_ref, verts_ref):
    # Batch folded into M:  T_all = A_flat (B*16, 24) @ W^T (24, Vt)
    t_all = jnp.dot(a_ref[...], w_ref[...], preferred_element_type=jnp.float32)
    for b in range(vp_ref.shape[0]):
        verts_ref[b] = _skin_rows(t_all[b * 16:(b + 1) * 16, :], vp_ref[b])


def _skin_kernel_full(a_ref, w_ref, vvt_ref, vp_ref, verts_ref, tt_ref, vpv_ref):
    t_all = jnp.dot(a_ref[...], w_ref[...], preferred_element_type=jnp.float32)
    tt_ref[...] = t_all
    vvt = vvt_ref[...]
    for b in range(vp_ref.shape[0]):
        vp_b = vp_ref[b]
        verts_ref[b] = _skin_rows(t_all[b * 16:(b + 1) * 16, :], vp_b)
        vpv_ref[b] = _skin_rows(vvt, vp_b)


def skin_min(a_flat, w_T, vp_cf):
    BM = a_flat.shape[0]
    NJ, Vp = w_T.shape
    B = vp_cf.shape[0]
    Vt = _pick_lane_tile(Vp)
    nt = Vp // Vt
    return pl.pallas_call(
        _skin_kernel_min,
        out_shape=jax.ShapeDtypeStruct((B, 3, Vp), jnp.float32),
        grid=(nt,),
        in_specs=[
            pl.BlockSpec((BM, NJ), lambda t: (0, 0)),
            pl.BlockSpec((NJ, Vt), lambda t: (0, t)),
            pl.BlockSpec((B, 3, Vt), lambda t: (0, 0, t)),
        ],
        out_specs=pl.BlockSpec((B, 3, Vt), lambda t: (0, 0, t)),
        compiler_params=pltpu.CompilerParams(
            dimension_semantics=("parallel",)),
    )(a_flat, w_T, vp_cf)


def skin_full(a_flat, w_T, vvt_T, vp_cf):
    BM = a_flat.shape[0]
    NJ, Vp = w_T.shape
    B = vp_cf.shape[0]
    Vt = _pick_lane_tile(Vp)
    nt = Vp // Vt
    return pl.pallas_call(
        _skin_kernel_full,
        out_shape=(jax.ShapeDtypeStruct((B, 3, Vp), jnp.float32),
                   jax.ShapeDtypeStruct((BM, Vp), jnp.float32),
                   jax.ShapeDtypeStruct((B, 3, Vp), jnp.float32)),
        grid=(nt,),
        in_specs=[
            pl.BlockSpec((BM, NJ), lambda t: (0, 0)),
            pl.BlockSpec((NJ, Vt), lambda t: (0, t)),
            pl.BlockSpec((16, Vt), lambda t: (0, t)),
            pl.BlockSpec((B, 3, Vt), lambda t: (0, 0, t)),
        ],
        out_specs=[
            pl.BlockSpec((B, 3, Vt), lambda t: (0, 0, t)),
            pl.BlockSpec((BM, Vt), lambda t: (0, t)),
            pl.BlockSpec((B, 3, Vt), lambda t: (0, 0, t)),
        ],
        compiler_params=pltpu.CompilerParams(
            dimension_semantics=("parallel",)),
    )(a_flat, w_T, vvt_T, vp_cf)


# ------------------------------------------------------------------
# Plain-JAX glue (small serial pieces)
# ------------------------------------------------------------------
def batch_rodrigues(rot_vecs, epsilon=1e-8):
    N = rot_vecs.shape[0]
    angle = jnp.linalg.norm(rot_vecs + epsilon, axis=1, keepdims=True)   # (N,1)
    rot_dir = rot_vecs / angle
    cos = jnp.cos(angle)[:, None, :]
    sin = jnp.sin(angle)[:, None, :]
    rx, ry, rz = jnp.split(rot_dir, 3, axis=1)
    zeros = jnp.zeros((N, 1), dtype=rot_vecs.dtype)
    K = jnp.concatenate([zeros, -rz, ry, rz, zeros, -rx, -ry, rx, zeros],
                        axis=1).reshape(N, 3, 3)
    ident = jnp.eye(3, dtype=rot_vecs.dtype)[None]
    return ident + sin * K + (1.0 - cos) * jnp.matmul(K, K)


def transform_mat(R, t):
    # R: (N,3,3), t: (N,3,1) -> (N,4,4)
    top = jnp.concatenate([R, t], axis=2)
    bottom = jnp.tile(jnp.array([[[0., 0., 0., 1.]]], dtype=R.dtype),
                      (R.shape[0], 1, 1))
    return jnp.concatenate([top, bottom], axis=1)


def batch_rigid_transform(rot_mats, joints, parents):
    # TODO(synk): sequential 24-joint kinematic-chain composition has no tiling win
    # on TPU -- kept as an unrolled plain-JAX loop (but jitted with the rest of LBS).
    B, N = joints.shape[:2]
    joints = joints[..., None]                                   # (B,N,3,1)
    rel_joints = joints.at[:, 1:].add(-joints[:, parents[1:]])
    transforms_mat = transform_mat(rot_mats.reshape(-1, 3, 3),
                                   rel_joints.reshape(-1, 3, 1)).reshape(B, N, 4, 4)
    chain = [transforms_mat[:, 0]]
    for i in range(1, N):
        chain.append(jnp.matmul(chain[int(parents[i])], transforms_mat[:, i]))
    transforms = jnp.stack(chain, axis=1)                         # (B,N,4,4)
    posed_joints = transforms[:, :, :3, 3]
    joints_homogen = jnp.concatenate(
        [joints, jnp.zeros_like(joints[:, :, :1])], axis=2)       # (B,N,4,1)
    rel_transforms = transforms - jnp.pad(
        jnp.matmul(transforms, joints_homogen),
        ((0, 0), (0, 0), (0, 0), (3, 0)))
    return posed_joints, rel_transforms


# ------------------------------------------------------------------
# Jitted LBS core (Rodrigues + chain + both pallas kernels in ONE computation)
# ------------------------------------------------------------------
@partial(jax.jit, static_argnames=("want_full", "num_verts"))
def _lbs_core(betas, full_pose, vvt_T, consts, want_full, num_verts):
    (v_template_flat, shapedirs2d, posedirs,
     j_template_flat, j_shapedirs_T, lbs_weights_T) = consts
    B = max(betas.shape[0], full_pose.shape[0])
    if betas.shape[0] != B:
        betas = jnp.broadcast_to(betas, (B, betas.shape[1]))
    Vp = lbs_weights_T.shape[1]
    V = num_verts

    rot_mats = batch_rodrigues(full_pose.reshape(-1, 3)).reshape(B, -1, 3, 3)
    ident = jnp.eye(3, dtype=jnp.float32)
    pose_feature = (rot_mats[:, 1:, :, :] - ident).reshape(B, -1)      # (B, 207)

    # Blend shapes + pose-corrective offsets (lane-dense channel-major 3Vp).
    v_posed_flat = blend_pose_shape(
        betas.astype(jnp.bfloat16), pose_feature.astype(jnp.bfloat16),
        v_template_flat, shapedirs2d, posedirs)                        # (B, 3Vp)
    vp_cf = v_posed_flat.reshape(B, 3, Vp)        # channel-first, no XLA transpose

    # De-fused joint regression: J = Jreg @ v_shaped is linear in betas.
    J = (j_template_flat + betas @ j_shapedirs_T).reshape(B, NUM_JOINTS_TOTAL, 3)

    J_transformed, A = batch_rigid_transform(rot_mats, J, SMPL_PARENTS)  # A:(B,24,4,4)
    a_flat = A.reshape(B, NUM_JOINTS_TOTAL, 16).transpose(0, 2, 1).reshape(
        B * 16, NUM_JOINTS_TOTAL)                                       # (B*16, 24)

    if want_full:
        verts_cf, tt, vpv_cf = skin_full(a_flat, lbs_weights_T, vvt_T, vp_cf)
        tt_cm = tt.reshape(B, 16, Vp)
        vT = tt_cm.transpose(0, 2, 1)[:, :V].reshape(B, V, 4, 4)
        v_posed_vit = vpv_cf[:, :, :V].transpose(0, 2, 1)               # (B,V,3)
    else:
        verts_cf = skin_min(a_flat, lbs_weights_T, vp_cf)
        tt_cm, vT, v_posed_vit = None, None, None

    verts = verts_cf[:, :, :V].transpose(0, 2, 1)                       # (B,V,3)
    # TODO(synk): jT convention is ambiguous in the original repo; we use the
    # relative (skinning) joint transforms A, the same kind of transform as vT.
    return {'verts': verts, 'joints': J_transformed, 'jT': A,
            'vT': vT, 'tt': tt_cm, 'v_posed_vit': v_posed_vit}


# ------------------------------------------------------------------
# SMPL_vitruvian (Pallas-backed)
# ------------------------------------------------------------------
class SMPLVitruvianPallas:
    NUM_JOINTS = 23
    NUM_BODY_JOINTS = 23
    NUM_BETAS = 10

    def __init__(self, key, batch_size=1, num_verts=512, half_angle=25,
                 num_extra_verts=21):
        self.batch_size = batch_size
        self.num_verts = num_verts
        self.vitruvian_angle = half_angle
        V = num_verts
        Vp = ((V + LANE - 1) // LANE) * LANE          # pad vertex axis to 128x
        self.num_verts_padded = Vp
        keys = jax.random.split(key, 6)

        # Synthetic deterministic SMPL buffers (shapes match the real model).
        self.v_template = 0.3 * jax.random.normal(keys[0], (V, 3), jnp.float32)
        self.shapedirs = 0.03 * jax.random.normal(keys[1], (V, 3, NUM_BETAS), jnp.float32)
        posedirs_full = 0.01 * jax.random.normal(keys[2], (V, 3, NUM_POSE_BASIS), jnp.float32)
        jr = jax.random.uniform(keys[3], (NUM_JOINTS_TOTAL, V), jnp.float32)
        self.J_regressor = jr / jnp.sum(jr, axis=1, keepdims=True)
        self.lbs_weights = jax.nn.softmax(
            4.0 * jax.random.normal(keys[4], (V, NUM_JOINTS_TOTAL), jnp.float32), axis=1)
        self.parents = SMPL_PARENTS
        self.extra_joints_idxs = jnp.asarray(
            np.sort(np.random.RandomState(0).choice(V, num_extra_verts,
                                                    replace=False)).astype(np.int32))

        # Default trainable parameters (all-zero, as in the torch __init__).
        self.betas = jnp.zeros((batch_size, NUM_BETAS), jnp.float32)
        self.global_orient = jnp.zeros((batch_size, 3), jnp.float32)
        self.body_pose = jnp.zeros((batch_size, self.NUM_BODY_JOINTS * 3), jnp.float32)
        self.transl = jnp.zeros((batch_size, 3), jnp.float32)

        # --- kernel-layout buffers (precomputed once) ---
        # Channel-major flat layout: flat index = c*Vp + v  (padded lanes are ZERO so
        # the tail tiles contribute nothing); big matmul weights stored bf16.
        vt_cm = jnp.zeros((3, Vp), jnp.float32).at[:, :V].set(self.v_template.T)
        self.v_template_flat = vt_cm.reshape(1, 3 * Vp)
        sd_cm = jnp.zeros((NUM_BETAS, 3, Vp), jnp.float32).at[:, :, :V].set(
            jnp.transpose(self.shapedirs, (2, 1, 0)))
        self.shapedirs2d = sd_cm.reshape(NUM_BETAS, 3 * Vp).astype(jnp.bfloat16)
        pd_cm = jnp.zeros((NUM_POSE_BASIS, 3, Vp), jnp.float32).at[:, :, :V].set(
            jnp.transpose(posedirs_full, (2, 1, 0)))
        self.posedirs = pd_cm.reshape(NUM_POSE_BASIS, 3 * Vp).astype(jnp.bfloat16)

        # De-fused joint regressor: J = Jreg @ v_shaped is linear in betas, so fold
        # it into a (1,72) constant + a tiny (10,72) matrix applied to betas.
        self.j_template_flat = (self.J_regressor @ self.v_template).reshape(
            1, 3 * NUM_JOINTS_TOTAL)
        self.j_shapedirs_T = jnp.einsum(
            'jv,vcn->njc', self.J_regressor, self.shapedirs).reshape(
            NUM_BETAS, 3 * NUM_JOINTS_TOTAL)

        lw_T = jnp.zeros((NUM_JOINTS_TOTAL, Vp), jnp.float32).at[:, :V].set(
            self.lbs_weights.T)
        self.lbs_weights_T = lw_T                                     # (24, Vp)
        # Identity per-vertex 4x4 in the (16, Vp) kernel layout (used before
        # initiate_vitruvian has produced the real transform).
        self._identity_vvt = jnp.tile(
            jnp.eye(4, dtype=jnp.float32).reshape(16, 1), (1, Vp))

        # Vitruvian state.
        self.vitruvian_pose = (jnp.zeros((1, 69), jnp.float32)
                               .at[0, 2].set(math.radians(half_angle))
                               .at[0, 5].set(math.radians(-half_angle)))
        self.vitruvian_vertices = None
        self.vitruvian_vertices_transform = None
        self.vitruvian_vertices_transform_T = None    # cached (16, Vp) kernel layout
        self.vitruvian_joints_transform = None

    # -------------------- LBS --------------------
    def lbs(self, betas, full_pose, vvt_T=None, want_full=False):
        if vvt_T is None:
            vvt_T = self._identity_vvt
        consts = (self.v_template_flat, self.shapedirs2d, self.posedirs,
                  self.j_template_flat, self.j_shapedirs_T, self.lbs_weights_T)
        return _lbs_core(betas, full_pose, vvt_T, consts,
                         want_full=want_full, num_verts=self.num_verts)

    # -------------------- vertex / joint selector --------------------
    def vertex_joint_selector(self, vertices, joints, with_transform=False,
                              vT=None, jT=None):
        extra_joints = jnp.take(vertices, self.extra_joints_idxs, axis=1)
        joints_out = jnp.concatenate([joints, extra_joints], axis=1)
        if with_transform:
            extra_T = jnp.take(vT, self.extra_joints_idxs, axis=1)
            jT_out = jnp.concatenate([jT, extra_T], axis=1)
            return joints_out, jT_out
        return joints_out

    # -------------------- vitruvian init --------------------
    def initiate_vitruvian(self, betas=None, vitruvian_angle=25):
        self.vitruvian_angle = vitruvian_angle
        self.vitruvian_pose = (jnp.zeros((1, 69), jnp.float32)
                               .at[0, 2].set(math.radians(vitruvian_angle))
                               .at[0, 5].set(math.radians(-vitruvian_angle)))
        body_pose = self.vitruvian_pose
        betas = betas if betas is not None else jnp.zeros((1, NUM_BETAS), jnp.float32)
        global_orient = jnp.zeros((1, 3), jnp.float32)
        full_pose = jnp.concatenate([global_orient, body_pose], axis=1)
        batch_size = max(betas.shape[0], global_orient.shape[0], body_pose.shape[0])

        ret = self.lbs(betas, full_pose, vvt_T=self._identity_vvt, want_full=True)
        vitruvian_vertices = ret['verts']
        vitruvian_joints = ret['joints']
        vT = ret['vT']                                               # (B,V,4,4)

        self.vitruvian_vertices_transform = vT
        # Cached kernel-layout (16, Vp) transform (batch entry 0).
        # TODO(synk): assumes a batch-1 vitruvian init, as in the reference usage.
        self.vitruvian_vertices_transform_T = ret['tt'][0]
        _, self.vitruvian_joints_transform = self.vertex_joint_selector(
            vitruvian_vertices, vitruvian_joints, True, vT, ret['jT'])
        self.vitruvian_vertices = vitruvian_vertices
        self.inverse_vitruvian_vertices_transform = jnp.linalg.inv(
            vT.reshape(-1, 4, 4)).reshape(batch_size, -1, 4, 4)
        self.inverse_vitruvian_joints_transform = jnp.linalg.inv(
            self.vitruvian_joints_transform.reshape(-1, 4, 4)).reshape(
            batch_size, -1, 4, 4)
        return self.vitruvian_vertices, vitruvian_joints

    # -------------------- forward --------------------
    def forward(self, betas=None, body_pose=None, global_orient=None, transl=None,
                return_verts=True, return_full_pose=False, custom_out=False):
        global_orient = global_orient if global_orient is not None else self.global_orient
        body_pose = body_pose if body_pose is not None else self.body_pose
        betas = betas if betas is not None else self.betas
        apply_trans = transl is not None or self.transl is not None
        if transl is None:
            transl = self.transl

        full_pose = jnp.concatenate([global_orient, body_pose], axis=1)
        batch_size = max(betas.shape[0], global_orient.shape[0], body_pose.shape[0])
        if betas.shape[0] != batch_size:
            betas = jnp.broadcast_to(betas, (batch_size, betas.shape[1]))

        # The cached vitruvian vertex transform is fed straight to the skin kernel
        # in its (16, Vp) layout -- no per-call broadcast/transpose.  The default
        # path uses the minimal kernel (no dead T_T / vposed_vit HBM writebacks).
        vvt_T = (self.vitruvian_vertices_transform_T
                 if self.vitruvian_vertices_transform_T is not None
                 else self._identity_vvt)
        ret = self.lbs(betas, full_pose, vvt_T=vvt_T, want_full=custom_out)

        vertices = ret['verts']
        joints = ret['joints']
        joints_transform = None
        vertex_transform = None
        vT = None
        if custom_out:
            vT = ret['vT']
            joints, joints_transform = self.vertex_joint_selector(
                vertices, joints, True, vT, ret['jT'])
        else:
            joints = self.vertex_joint_selector(vertices, joints)

        if apply_trans:
            joints = joints + transl[:, None, :]
            vertices = vertices + transl[:, None, :]
            if custom_out:
                joints_transform = joints_transform.at[:, :, :3, 3].add(transl[:, None, :])
                vertex_transform = vT.at[:, :, :3, 3].add(transl[:, None, :])
                inv_jt = jnp.broadcast_to(
                    self.inverse_vitruvian_joints_transform,
                    (batch_size,) + self.inverse_vitruvian_joints_transform.shape[1:])
                inv_vt = jnp.broadcast_to(
                    self.inverse_vitruvian_vertices_transform,
                    (batch_size,) + self.inverse_vitruvian_vertices_transform.shape[1:])
                joints_transform = jnp.matmul(
                    joints_transform.reshape(-1, 4, 4),
                    inv_jt.reshape(-1, 4, 4)).reshape(batch_size, -1, 4, 4)
                vertex_transform = jnp.matmul(
                    vertex_transform.reshape(-1, 4, 4),
                    inv_vt.reshape(-1, 4, 4)).reshape(batch_size, -1, 4, 4)

        v_shaped_out = None
        v_posed_out = None
        if custom_out:
            v_shaped_out = jnp.broadcast_to(
                self.vitruvian_vertices,
                (batch_size,) + self.vitruvian_vertices.shape[1:])
            v_posed_out = ret['v_posed_vit']                          # (B,V,3)

        return ModelOutput(
            vertices=vertices if return_verts else None,
            global_orient=global_orient,
            body_pose=body_pose,
            joints=joints,
            betas=betas,
            full_pose=full_pose if return_full_pose else None,
            expression=None, left_hand_pose=None, right_hand_pose=None, jaw_pose=None,
            joint_transform=joints_transform if custom_out else None,
            vertex_transform=vertex_transform if custom_out else None,
            v_shaped=v_shaped_out if custom_out else None,
            v_posed=v_posed_out if custom_out else None)


# ------------------------------------------------------------------
if __name__ == "__main__":
    key = jax.random.PRNGKey(0)
    pkey, ikey = jax.random.split(key)

    B, V = 2, 512
    model = SMPLVitruvianPallas(pkey, batch_size=B, num_verts=V, half_angle=25)
    model.initiate_vitruvian()

    k1, k2, k3, k4 = jax.random.split(ikey, 4)
    betas = 0.1 * jax.random.normal(k1, (B, 10), jnp.float32)
    body_pose = 0.1 * jax.random.normal(k2, (B, 69), jnp.float32)
    global_orient = 0.1 * jax.random.normal(k3, (B, 3), jnp.float32)
    transl = 0.1 * jax.random.normal(k4, (B, 3), jnp.float32)

    # Default path (minimal skin kernel, no dead writebacks).
    out = model.forward(betas=betas, body_pose=body_pose,
                        global_orient=global_orient, transl=transl)
    jax.block_until_ready(out.vertices)
    jax.block_until_ready(out.joints)
    assert out.vertices.shape == (B, V, 3)
    assert out.joints.shape == (B, 24 + 21, 3)
    assert bool(jnp.all(jnp.isfinite(out.vertices)))
    assert bool(jnp.all(jnp.isfinite(out.joints)))

    # custom_out path (full skin kernel: per-vertex transforms + vitruvian v_posed).
    out_c = model.forward(betas=betas, body_pose=body_pose,
                          global_orient=global_orient, transl=transl, custom_out=True)
    jax.block_until_ready(out_c.vertex_transform)
    assert out_c.vertices.shape == (B, V, 3)
    assert out_c.vertex_transform.shape == (B, V, 4, 4)
    assert out_c.joint_transform.shape == (B, 24 + 21, 4, 4)
    assert out_c.v_posed.shape == (B, V, 3)
    assert out_c.v_shaped.shape == (B, V, 3)
    assert bool(jnp.all(jnp.isfinite(out_c.vertex_transform)))
    assert bool(jnp.all(jnp.isfinite(out_c.v_posed)))

    print("KERNEL_OK")
</pallas_src>

<mosaic_0001>
module attributes {stable_mosaic.version = 11 : i64} {
  func.func @_blend_kernel(%arg0: i32, %arg1: memref<1x10xbf16, #tpu.memory_space<vmem>>, %arg2: memref<1x207xbf16, #tpu.memory_space<vmem>>, %arg3: memref<1x1536xf32, #tpu.memory_space<vmem>>, %arg4: memref<10x1536xbf16, #tpu.memory_space<vmem>>, %arg5: memref<207x1536xbf16, #tpu.memory_space<vmem>>, %arg6: memref<1x1536xf32, #tpu.memory_space<vmem>>) attributes {dimension_semantics = [#tpu.dimension_semantics<parallel>], iteration_bounds = array<i64: 1>, scalar_prefetch = 0 : i64, scratch_operands = 0 : i64, tpu.core_type = #tpu.core_type<tc>, window_params = [{pipeline_mode = #tpu.pipeline_mode<synchronous>, transform_indices = @transform_0, window_bounds = array<i64: 1, 10>}, {pipeline_mode = #tpu.pipeline_mode<synchronous>, transform_indices = @transform_1, window_bounds = array<i64: 1, 207>}, {transform_indices = @transform_2, window_bounds = array<i64: 1, 1536>}, {transform_indices = @transform_3, window_bounds = array<i64: 10, 1536>}, {transform_indices = @transform_4, window_bounds = array<i64: 207, 1536>}, {transform_indices = @transform_5, window_bounds = array<i64: 1, 1536>}]} {
    %c0 = arith.constant 0 : index
    %c0_0 = arith.constant 0 : index
    %0 = vector.load %arg3[%c0, %c0_0] : memref<1x1536xf32, #tpu.memory_space<vmem>>, vector<1x1536xf32>
    %c0_1 = arith.constant 0 : index
    %c0_2 = arith.constant 0 : index
    %1 = vector.load %arg1[%c0_1, %c0_2] : memref<1x10xbf16, #tpu.memory_space<vmem>>, vector<1x10xbf16>
    %c0_3 = arith.constant 0 : index
    %c0_4 = arith.constant 0 : index
    %2 = vector.load %arg4[%c0_3, %c0_4] : memref<10x1536xbf16, #tpu.memory_space<vmem>>, vector<10x1536xbf16>
    %cst = arith.constant dense<0.000000e+00> : vector<1x1536xf32>
    %3 = tpu.matmul %1, %2, %cst {dimension_numbers = #tpu.dot_dimension_numbers<[1], [0], [0], [1], [0, 0, 1, 1], [], []>} : vector<1x10xbf16>, vector<10x1536xbf16>, vector<1x1536xf32> -> vector<1x1536xf32>
    %4 = arith.addf %0, %3 : vector<1x1536xf32>
    %c0_5 = arith.constant 0 : index
    %c0_6 = arith.constant 0 : index
    %5 = vector.load %arg2[%c0_5, %c0_6] : memref<1x207xbf16, #tpu.memory_space<vmem>>, vector<1x207xbf16>
    %c0_7 = arith.constant 0 : index
    %c0_8 = arith.constant 0 : index
    %6 = vector.load %arg5[%c0_7, %c0_8] : memref<207x1536xbf16, #tpu.memory_space<vmem>>, vector<207x1536xbf16>
    %cst_9 = arith.constant dense<0.000000e+00> : vector<1x1536xf32>
    %7 = tpu.matmul %5, %6, %cst_9 {dimension_numbers = #tpu.dot_dimension_numbers<[1], [0], [0], [1], [0, 0, 1, 1], [], []>} : vector<1x207xbf16>, vector<207x1536xbf16>, vector<1x1536xf32> -> vector<1x1536xf32>
    %8 = arith.addf %4, %7 : vector<1x1536xf32>
    %c0_10 = arith.constant 0 : index
    %c0_11 = arith.constant 0 : index
    %9 = vector.load %arg6[%c0_10, %c0_11] : memref<1x1536xf32, #tpu.memory_space<vmem>>, vector<1x1536xf32>
    tpu.vector_store %arg6[%c0_10, %c0_11], %8 {strides = array<i32>} : memref<1x1536xf32, #tpu.memory_space<vmem>>, vector<1x1536xf32>,
    return
  }
  func.func @transform_0(%arg0: i32) -> (i32, i32) {
    %c0_i32 = arith.constant 0 : i32
    %c0_i32_0 = arith.constant 0 : i32
    %c0_i32_1 = arith.constant 0 : i32
    return %c0_i32, %c0_i32_0 : i32, i32
  }
  func.func @transform_1(%arg0: i32) -> (i32, i32) {
    %c0_i32 = arith.constant 0 : i32
    %c0_i32_0 = arith.constant 0 : i32
    %c0_i32_1 = arith.constant 0 : i32
    return %c0_i32, %c0_i32_0 : i32, i32
  }
  func.func @transform_2(%arg0: i32) -> (i32, i32) {
    %c0_i32 = arith.constant 0 : i32
    %c0_i32_0 = arith.constant 0 : i32
    return %c0_i32, %arg0 : i32, i32
  }
  func.func @transform_3(%arg0: i32) -> (i32, i32) {
    %c0_i32 = arith.constant 0 : i32
    %c0_i32_0 = arith.constant 0 : i32
    return %c0_i32, %arg0 : i32, i32
  }
  func.func @transform_4(%arg0: i32) -> (i32, i32) {
    %c0_i32 = arith.constant 0 : i32
    %c0_i32_0 = arith.constant 0 : i32
    return %c0_i32, %arg0 : i32, i32
  }
  func.func @transform_5(%arg0: i32) -> (i32, i32) {
    %c0_i32 = arith.constant 0 : i32
    %c0_i32_0 = arith.constant 0 : i32
    return %c0_i32, %arg0 : i32, i32
  }
}

module attributes {stable_mosaic.version = 11 : i64} {
  func.func @_skin_kernel_full(%arg0: i32, %arg1: memref<16x24xf32, #tpu.memory_space<vmem>>, %arg2: memref<24x512xf32, #tpu.memory_space<vmem>>, %arg3: memref<16x512xf32, #tpu.memory_space<vmem>>, %arg4: memref<1x3x512xf32, #tpu.memory_space<vmem>>, %arg5: memref<1x3x512xf32, #tpu.memory_space<vmem>>, %arg6: memref<16x512xf32, #tpu.memory_space<vmem>>, %arg7: memref<1x3x512xf32, #tpu.memory_space<vmem>>) attributes {dimension_semantics = [#tpu.dimension_semantics<parallel>], iteration_bounds = array<i64: 1>, scalar_prefetch = 0 : i64, scratch_operands = 0 : i64, tpu.core_type = #tpu.core_type<tc>, window_params = [{pipeline_mode = #tpu.pipeline_mode<synchronous>, transform_indices = @transform_0, window_bounds = array<i64: 16, 24>}, {transform_indices = @transform_1, window_bounds = array<i64: 24, 512>}, {transform_indices = @transform_2, window_bounds = array<i64: 16, 512>}, {transform_indices = @transform_3, window_bounds = array<i64: 1, 3, 512>}, {transform_indices = @transform_4, window_bounds = array<i64: 1, 3, 512>}, {transform_indices = @transform_5, window_bounds = array<i64: 16, 512>}, {transform_indices = @transform_6, window_bounds = array<i64: 1, 3, 512>}]} {
    %c0 = arith.constant 0 : index
    %c0_0 = arith.constant 0 : index
    %0 = vector.load %arg1[%c0, %c0_0] : memref<16x24xf32, #tpu.memory_space<vmem>>, vector<16x24xf32>
    %c0_1 = arith.constant 0 : index
    %c0_2 = arith.constant 0 : index
    %1 = vector.load %arg2[%c0_1, %c0_2] : memref<24x512xf32, #tpu.memory_space<vmem>>, vector<24x512xf32>
    %cst = arith.constant dense<0.000000e+00> : vector<16x512xf32>
    %2 = tpu.matmul %0, %1, %cst {dimension_numbers = #tpu.dot_dimension_numbers<[1], [0], [0], [1], [0, 0, 1, 1], [], []>} : vector<16x24xf32>, vector<24x512xf32>, vector<16x512xf32> -> vector<16x512xf32>
    %c0_3 = arith.constant 0 : index
    %c0_4 = arith.constant 0 : index
    %3 = vector.load %arg6[%c0_3, %c0_4] : memref<16x512xf32, #tpu.memory_space<vmem>>, vector<16x512xf32>
    tpu.vector_store %arg6[%c0_3, %c0_4], %2 {strides = array<i32>} : memref<16x512xf32, #tpu.memory_space<vmem>>, vector<16x512xf32>,
    %c0_5 = arith.constant 0 : index
    %c0_6 = arith.constant 0 : index
    %4 = vector.load %arg3[%c0_5, %c0_6] : memref<16x512xf32, #tpu.memory_space<vmem>>, vector<16x512xf32>
    %c0_7 = arith.constant 0 : index
    %c0_8 = arith.constant 0 : index
    %c0_9 = arith.constant 0 : index
    %5 = vector.load %arg4[%c0_7, %c0_8, %c0_9] : memref<1x3x512xf32, #tpu.memory_space<vmem>>, vector<1x3x512xf32>
    %6 = vector.shape_cast %5 : vector<1x3x512xf32> to vector<3x512xf32>
    %7 = vector.extract_strided_slice %2 {offsets = [0, 0], sizes = [1, 512], strides = [1, 1]} : vector<16x512xf32> to vector<1x512xf32>
    %8 = vector.extract_strided_slice %6 {offsets = [0, 0], sizes = [1, 512], strides = [1, 1]} : vector<3x512xf32> to vector<1x512xf32>
    %9 = arith.mulf %7, %8 : vector<1x512xf32>
    %10 = vector.extract_strided_slice %2 {offsets = [1, 0], sizes = [1, 512], strides = [1, 1]} : vector<16x512xf32> to vector<1x512xf32>
    %11 = vector.extract_strided_slice %6 {offsets = [1, 0], sizes = [1, 512], strides = [1, 1]} : vector<3x512xf32> to vector<1x512xf32>
    %12 = arith.mulf %10, %11 : vector<1x512xf32>
    %13 = arith.addf %9, %12 : vector<1x512xf32>
    %14 = vector.extract_strided_slice %2 {offsets = [2, 0], sizes = [1, 512], strides = [1, 1]} : vector<16x512xf32> to vector<1x512xf32>
    %15 = vector.extract_strided_slice %6 {offsets = [2, 0], sizes = [1, 512], strides = [1, 1]} : vector<3x512xf32> to vector<1x512xf32>
    %16 = arith.mulf %14, %15 : vector<1x512xf32>
    %17 = arith.addf %13, %16 : vector<1x512xf32>
    %18 = vector.extract_strided_slice %2 {offsets = [3, 0], sizes = [1, 512], strides = [1, 1]} : vector<16x512xf32> to vector<1x512xf32>
    %19 = arith.addf %17, %18 : vector<1x512xf32>
    %20 = vector.extract_strided_slice %2 {offsets = [4, 0], sizes = [1, 512], strides = [1, 1]} : vector<16x512xf32> to vector<1x512xf32>
    %21 = vector.extract_strided_slice %6 {offsets = [0, 0], sizes = [1, 512], strides = [1, 1]} : vector<3x512xf32> to vector<1x512xf32>
    %22 = arith.mulf %20, %21 : vector<1x512xf32>
    %23 = vector.extract_strided_slice %2 {offsets = [5, 0], sizes = [1, 512], strides = [1, 1]} : vector<16x512xf32> to vector<1x512xf32>
    %24 = vector.extract_strided_slice %6 {offsets = [1, 0], sizes = [1, 512], strides = [1, 1]} : vector<3x512xf32> to vector<1x512xf32>
    %25 = arith.mulf %23, %24 : vector<1x512xf32>
    %26 = arith.addf %22, %25 : vector<1x512xf32>
    %27 = vector.extract_strided_slice %2 {offsets = [6, 0], sizes = [1, 512], strides = [1, 1]} : vector<16x512xf32> to vector<1x512xf32>
    %28 = vector.extract_strided_slice %6 {offsets = [2, 0], sizes = [1, 512], strides = [1, 1]} : vector<3x512xf32> to vector<1x512xf32>
    %29 = arith.mulf %27, %28 : vector<1x512xf32>
    %30 = arith.addf %26, %29 : vector<1x512xf32>
    %31 = vector.extract_strided_slice %2 {offsets = [7, 0], sizes = [1, 512], strides = [1, 1]} : vector<16x512xf32> to vector<1x512xf32>
    %32 = arith.addf %30, %31 : vector<1x512xf32>
    %33 = vector.extract_strided_slice %2 {offsets = [8, 0], sizes = [1, 512], strides = [1, 1]} : vector<16x512xf32> to vector<1x512xf32>
    %34 = vector.extract_strided_slice %6 {offsets = [0, 0], sizes = [1, 512], strides = [1, 1]} : vector<3x512xf32> to vector<1x512xf32>
    %35 = arith.mulf %33, %34 : vector<1x512xf32>
    %36 = vector.extract_strided_slice %2 {offsets = [9, 0], sizes = [1, 512], strides = [1, 1]} : vector<16x512xf32> to vector<1x512xf32>
    %37 = vector.extract_strided_slice %6 {offsets = [1, 0], sizes = [1, 512], strides = [1, 1]} : vector<3x512xf32> to vector<1x512xf32>
    %38 = arith.mulf %36, %37 : vector<1x512xf32>
    %39 = arith.addf %35, %38 : vector<1x512xf32>
    %40 = vector.extract_strided_slice %2 {offsets = [10, 0], sizes = [1, 512], strides = [1, 1]} : vector<16x512xf32> to vector<1x512xf32>
    %41 = vector.extract_strided_slice %6 {offsets = [2, 0], sizes = [1, 512], strides = [1, 1]} : vector<3x512xf32> to vector<1x512xf32>
    %42 = arith.mulf %40, %41 : vector<1x512xf32>
    %43 = arith.addf %39, %42 : vector<1x512xf32>
    %44 = vector.extract_strided_slice %2 {offsets = [11, 0], sizes = [1, 512], strides = [1, 1]} : vector<16x512xf32> to vector<1x512xf32>
    %45 = arith.addf %43, %44 : vector<1x512xf32>
    %46 = tpu.concatenate %19, %32, %45 in 0 : vector<1x512xf32>, vector<1x512xf32>, vector<1x512xf32> -> vector<3x512xf32>
    %c0_10 = arith.constant 0 : index
    %c0_11 = arith.constant 0 : index
    %c0_12 = arith.constant 0 : index
    %47 = vector.load %arg5[%c0_10, %c0_11, %c0_12] : memref<1x3x512xf32, #tpu.memory_space<vmem>>, vector<1x3x512xf32>
    %48 = vector.shape_cast %47 : vector<1x3x512xf32> to vector<3x512xf32>
    %49 = vector.shape_cast %46 : vector<3x512xf32> to vector<1x3x512xf32>
    tpu.vector_store %arg5[%c0_10, %c0_11, %c0_12], %49 {strides = array<i32>} : memref<1x3x512xf32, #tpu.memory_space<vmem>>, vector<1x3x512xf32>,
    %50 = vector.extract_strided_slice %4 {offsets = [0, 0], sizes = [1, 512], strides = [1, 1]} : vector<16x512xf32> to vector<1x512xf32>
    %51 = vector.extract_strided_slice %6 {offsets = [0, 0], sizes = [1, 512], strides = [1, 1]} : vector<3x512xf32> to vector<1x512xf32>
    %52 = arith.mulf %50, %51 : vector<1x512xf32>
    %53 = vector.extract_strided_slice %4 {offsets = [1, 0], sizes = [1, 512], strides = [1, 1]} : vector<16x512xf32> to vector<1x512xf32>
    %54 = vector.extract_strided_slice %6 {offsets = [1, 0], sizes = [1, 512], strides = [1, 1]} : vector<3x512xf32> to vector<1x512xf32>
    %55 = arith.mulf %53, %54 : vector<1x512xf32>
    %56 = arith.addf %52, %55 : vector<1x512xf32>
    %57 = vector.extract_strided_slice %4 {offsets = [2, 0], sizes = [1, 512], strides = [1, 1]} : vector<16x512xf32> to vector<1x512xf32>
    %58 = vector.extract_strided_slice %6 {offsets = [2, 0], sizes = [1, 512], strides = [1, 1]} : vector<3x512xf32> to vector<1x512xf32>
    %59 = arith.mulf %57, %58 : vector<1x512xf32>
    %60 = arith.addf %56, %59 : vector<1x512xf32>
    %61 = vector.extract_strided_slice %4 {offsets = [3, 0], sizes = [1, 512], strides = [1, 1]} : vector<16x512xf32> to vector<1x512xf32>
    %62 = arith.addf %60, %61 : vector<1x512xf32>
    %63 = vector.extract_strided_slice %4 {offsets = [4, 0], sizes = [1, 512], strides = [1, 1]} : vector<16x512xf32> to vector<1x512xf32>
    %64 = vector.extract_strided_slice %6 {offsets = [0, 0], sizes = [1, 512], strides = [1, 1]} : vector<3x512xf32> to vector<1x512xf32>
    %65 = arith.mulf %63, %64 : vector<1x512xf32>
    %66 = vector.extract_strided_slice %4 {offsets = [5, 0], sizes = [1, 512], strides = [1, 1]} : vector<16x512xf32> to vector<1x512xf32>
    %67 = vector.extract_strided_slice %6 {offsets = [1, 0], sizes = [1, 512], strides = [1, 1]} : vector<3x512xf32> to vector<1x512xf32>
    %68 = arith.mulf %66, %67 : vector<1x512xf32>
    %69 = arith.addf %65, %68 : vector<1x512xf32>
    %70 = vector.extract_strided_slice %4 {offsets = [6, 0], sizes = [1, 512], strides = [1, 1]} : vector<16x512xf32> to vector<1x512xf32>
    %71 = vector.extract_strided_slice %6 {offsets = [2, 0], sizes = [1, 512], strides = [1, 1]} : vector<3x512xf32> to vector<1x512xf32>
    %72 = arith.mulf %70, %71 : vector<1x512xf32>
    %73 = arith.addf %69, %72 : vector<1x512xf32>
    %74 = vector.extract_strided_slice %4 {offsets = [7, 0], sizes = [1, 512], strides = [1, 1]} : vector<16x512xf32> to vector<1x512xf32>
    %75 = arith.addf %73, %74 : vector<1x512xf32>
    %76 = vector.extract_strided_slice %4 {offsets = [8, 0], sizes = [1, 512], strides = [1, 1]} : vector<16x512xf32> to vector<1x512xf32>
    %77 = vector.extract_strided_slice %6 {offsets = [0, 0], sizes = [1, 512], strides = [1, 1]} : vector<3x512xf32> to vector<1x512xf32>
    %78 = arith.mulf %76, %77 : vector<1x512xf32>
    %79 = vector.extract_strided_slice %4 {offsets = [9, 0], sizes = [1, 512], strides = [1, 1]} : vector<16x512xf32> to vector<1x512xf32>
    %80 = vector.extract_strided_slice %6 {offsets = [1, 0], sizes = [1, 512], strides = [1, 1]} : vector<3x512xf32> to vector<1x512xf32>
    %81 = arith.mulf %79, %80 : vector<1x512xf32>
    %82 = arith.addf %78, %81 : vector<1x512xf32>
    %83 = vector.extract_strided_slice %4 {offsets = [10, 0], sizes = [1, 512], strides = [1, 1]} : vector<16x512xf32> to vector<1x512xf32>
    %84 = vector.extract_strided_slice %6 {offsets = [2, 0], sizes = [1, 512], strides = [1, 1]} : vector<3x512xf32> to vector<1x512xf32>
    %85 = arith.mulf %83, %84 : vector<1x512xf32>
    %86 = arith.addf %82, %85 : vector<1x512xf32>
    %87 = vector.extract_strided_slice %4 {offsets = [11, 0], sizes = [1, 512], strides = [1, 1]} : vector<16x512xf32> to vector<1x512xf32>
    %88 = arith.addf %86, %87 : vector<1x512xf32>
    %89 = tpu.concatenate %62, %75, %88 in 0 : vector<1x512xf32>, vector<1x512xf32>, vector<1x512xf32> -> vector<3x512xf32>
    %c0_13 = arith.constant 0 : index
    %c0_14 = arith.constant 0 : index
    %c0_15 = arith.constant 0 : index
    %90 = vector.load %arg7[%c0_13, %c0_14, %c0_15] : memref<1x3x512xf32, #tpu.memory_space<vmem>>, vector<1x3x512xf32>
    %91 = vector.shape_cast %90 : vector<1x3x512xf32> to vector<3x512xf32>
    %92 = vector.shape_cast %89 : vector<3x512xf32> to vector<1x3x512xf32>
    tpu.vector_store %arg7[%c0_13, %c0_14, %c0_15], %92 {strides = array<i32>} : memref<1x3x512xf32, #tpu.memory_space<vmem>>, vector<1x3x512xf32>,
    return
  }
  func.func @transform_0(%arg0: i32) -> (i32, i32) {
    %c0_i32 = arith.constant 0 : i32
    %c0_i32_0 = arith.constant 0 : i32
    %c0_i32_1 = arith.constant 0 : i32
    return %c0_i32, %c0_i32_0 : i32, i32
  }
  func.func @transform_1(%arg0: i32) -> (i32, i32) {
    %c0_i32 = arith.constant 0 : i32
    %c0_i32_0 = arith.constant 0 : i32
    return %c0_i32, %arg0 : i32, i32
  }
  func.func @transform_2(%arg0: i32) -> (i32, i32) {
    %c0_i32 = arith.constant 0 : i32
    %c0_i32_0 = arith.constant 0 : i32
    return %c0_i32, %arg0 : i32, i32
  }
  func.func @transform_3(%arg0: i32) -> (i32, i32, i32) {
    %c0_i32 = arith.constant 0 : i32
    %c0_i32_0 = arith.constant 0 : i32
    %c0_i32_1 = arith.constant 0 : i32
    return %c0_i32, %c0_i32_0, %arg0 : i32, i32, i32
  }
  func.func @transform_4(%arg0: i32) -> (i32, i32, i32) {
    %c0_i32 = arith.constant 0 : i32
    %c0_i32_0 = arith.constant 0 : i32
    %c0_i32_1 = arith.constant 0 : i32
    return %c0_i32, %c0_i32_0, %arg0 : i32, i32, i32
  }
  func.func @transform_5(%arg0: i32) -> (i32, i32) {
    %c0_i32 = arith.constant 0 : i32
    %c0_i32_0 = arith.constant 0 : i32
    return %c0_i32, %arg0 : i32, i32
  }
  func.func @transform_6(%arg0: i32) -> (i32, i32, i32) {
    %c0_i32 = arith.constant 0 : i32
    %c0_i32_0 = arith.constant 0 : i32
    %c0_i32_1 = arith.constant 0 : i32
    return %c0_i32, %c0_i32_0, %arg0 : i32, i32, i32
  }
}

</mosaic_0001>

<bundles_post_ra>
// kernel: _lbs_core.3
= control target key start
LH: loop header
LB: loop body
LE: loop exit
PB: predicated region body
PF: predicated region fallthrough
CT: control target
= control target key end

     0   :  { %v626_v3 = vmov 0.0   ;;  %vm34_vm0 = vcmask 195584   ;;  %v215_v19 = vlaneseq  ;;  %vm419_vm1 = vcmask 1040384   ;;  %s893_s1 = inlined_call_operand.vmem [shape: f32[24,512], index: 1, kind: input, shape index: {}]   ;;  %s894_s0 = inlined_call_operand.vmem [shape: f32[16,24], index: 0, kind: input, shape index: {}]   ;;  %s895_s3 = inlined_call_operand.vmem [shape: f32[1,3,512], index: 3, kind: input, shape index: {}]   ;;  %s896_s2 = inlined_call_operand.vmem [shape: f32[16,512], index: 2, kind: input, shape index: {}]   ;;  %s897_s6 = inlined_call_operand.vmem [shape: f32[1,3,512], index: 6, kind: output, shape index: {2}]   ;;  %s898_s5 = inlined_call_operand.vmem [shape: f32[16,512], index: 5, kind: output, shape index: {1}]   ;;  %s899_s4 = inlined_call_operand.vmem [shape: f32[1,3,512], index: 4, kind: output, shape index: {0}]  }
   0x1   :  { %v23_v0 = vld [vmem:[%s893_s1 + $0x8] sm:$0xff]  ;;  %v25_v2 = vld [vmem:[%s893_s1 + $0x18] sm:$0xff]  ;;  %105 = vmatprep.mubr.f32.mxu0 %v626_v3  ;;  %182 = vmatprep.mubr.f32.mxu1 %v626_v3  ;;  %v22_v6 = vld [vmem:[%s893_s1] sm:$0xff]  ;;  %vm424_vm2 = vcmask 1041408  }
   0x2   :  { %v27_v1 = vld [vmem:[%s893_s1 + $0x28] sm:$0xff]  ;;  %v29_v5 = vld [vmem:[%s893_s1 + $0x38] sm:$0xff]  ;;  %v26_v7 = vld [vmem:[%s893_s1 + $0x20] sm:$0xff]  ;;  %v704_v20 = vshrl.u32 %v215_v19, 7 }
   0x3   :  { %v617_v4 = vpack.c.bf16 %v27_v1, %v23_v0  ;;  %v621_v8 = vpack.c.bf16 %v29_v5, %v25_v2  ;;  %v619_v9 = vpack.c.bf16 %v26_v7, %v22_v6  ;;  %v24_v10 = vld [vmem:[%s893_s1 + $0x10] sm:$0xff]  ;;  %v31_v12 = vld [vmem:[%s893_s1 + $0x48] sm:$0xff]  ;;  %v33_v14 = vld [vmem:[%s893_s1 + $0x58] sm:$0xff] }
   0x4   :  { %v28_v11 = vld [vmem:[%s893_s1 + $0x30] sm:$0xff]  ;;  %v30_v15 = vld [vmem:[%s893_s1 + $0x40] sm:$0xff]  ;;  %v21_v18 = vld [vmem:[%s894_s0 + $0x8] sm:$0xff]  ;;  %v241_v21 = vsub.s32 1, %v704_v20  ;;  %v217_v23 = vsub.s32 0, %v704_v20  ;;  %v281_v24 = vsub.s32 2, %v704_v20 }
   0x5   :  { %618 = vmatprep.subr.bf16.mxu0 %v617_v4  ;;  %v623_v13 = vpack.c.bf16 %v28_v11, %v24_v10  ;;  %622 = vmatprep.subr.bf16.mxu1 %v621_v8  ;;  %v32_v16 = vld [vmem:[%s893_s1 + $0x50] sm:$0xff]  ;;  %v20_v17 = vld [vmem:[%s894_s0] sm:$0xff]  ;;  %v212_v25 = vld [vmem:[%s895_s3 + $0x8] sm:$0x77]  ;;  %v221_v27 = vsub.s32 4, %v704_v20  ;;  %v245_v28 = vsub.s32 5, %v704_v20 }
   0x6   :  { %620 = vmatpush1.bf16.msra.mxu0 %v619_v9  ;;  %v211_v22 = vld [vmem:[%s895_s3] sm:$0x77]  ;;  %v725_v31 = vrot.slane %v212_v25, %v241_v21  ;;  %v205_v34 = vld [vmem:[%s896_s2 + $0x10] sm:$0xff]  ;;  %v740_v37 = vrot.slane %v212_v25, %v217_v23  ;;  %v742_v38 = vrot.slane %v212_v25, %v281_v24  ;;  %v204_v48 = vld [vmem:[%s896_s2 + $0x8] sm:$0xff]  ;;  %v285_v56 = vsub.s32 6, %v704_v20 }
   0x7   :  { %624 = vmatpush1.bf16.msra.mxu1 %v623_v13  ;;  %45 = vmatprep.subr.mxu0 %v31_v12  ;;  %v203_v26 = vld [vmem:[%s896_s2] sm:$0xff]  ;;  %v723_v30 = vrot.slane %v211_v22, %v241_v21  ;;  %v727_v32 = vrot.slane %v211_v22, %v217_v23  ;;  %v729_v33 = vrot.slane %v211_v22, %v281_v24  ;;  %v738_v36 = vld [vmem:[%s896_s2 + $0x30] sm:$0xff]  ;;  %v489_v11 = vrot.slane %v205_v34, 3  ;;  %v208_v12 = vld [vmem:[%s896_s2 + $0x28] sm:$0xff] }
   0x8   :  { %122 = vmatprep.subr.mxu1 %v33_v14  ;;  %v207_v29 = vld [vmem:[%s896_s2 + $0x20] sm:$0xff]  ;;  %v445_v39 = vmul.f32 %v725_v31, %v205_v34  ;;  %v505_v41 = vmul.f32 %v725_v31, %v738_v36  ;;  %v748_v42 = vrot.slane %v211_v22, %v221_v27  ;;  %v750_v43 = vrot.slane %v211_v22, %v245_v28  ;;  %v206_v21 = vld [vmem:[%s896_s2 + $0x18] sm:$0xff] }
   0x9   :  { %v443_v35 = vmul.f32 %v723_v30, %v203_v26  ;;  %v503_v40 = vmul.f32 %v723_v30, %v207_v29  ;;  %v439_v44 = vmul.f32 %v727_v32, %v203_v26  ;;  %v463_v46 = vmul.f32 %v729_v33, %v203_v26 }
   0xa   :  { %46 = vmatpush1.msra.mxu0 %v30_v15  ;;  %v441_v47 = vmul.f32 %v740_v37, %v205_v34  ;;  %v499_v49 = vmul.f32 %v727_v32, %v207_v29  ;;  %v523_v51 = vmul.f32 %v729_v33, %v207_v29  ;;  %v453_v52 = vrot.slane %v445_v39, 1  ;;  %v210_v39 = vld [vmem:[%s896_s2 + $0x38] sm:$0xff] }
   0xb   :  { %123 = vmatpush1.msra.mxu1 %v32_v16  ;;  %613 = vmatmul.mubr.msk.f32.vlgmr.msra.gmra.mrb[0].mxu0 %vm34_vm0, %v20_v17  ;;  %v451_v45 = vrot.slane %v443_v35, 1  ;;  %v511_v50 = vrot.slane %v503_v40, 1  ;;  %v471_v54 = vrot.slane %v463_v46, 2  ;;  %v465_v55 = vmul.f32 %v742_v38, %v205_v34 }
   0xc   :  { %615 = vmatmul.mubr.msk.f32.vlgmr.msra.gmra.mrb[0].mxu1 %vm34_vm0, %v20_v17  ;;  %111 = vmatprep.mubr.f32.mxu0 %v626_v3  ;;  %v531_v58 = vrot.slane %v523_v51, 2  ;;  %v461_v59 = vadd.f32 %v453_v52, %v441_v47  ;;  %v444_v60 = vmul.f32 %v750_v43, %v204_v48  ;;  %v487_v62 = vrot.slane %v203_v26, 3 }
   0xd   :  { %188 = vmatprep.mubr.f32.mxu1 %v626_v3  ;;  %v459_v53 = vadd.f32 %v451_v45, %v439_v44  ;;  %v519_v57 = vadd.f32 %v511_v50, %v499_v49  ;;  %v473_v63 = vrot.slane %v465_v55, 2  ;;  %v501_v0 = vmul.f32 %v740_v37, %v738_v36 }
   0xe   :  { %v547_v2 = vrot.slane %v207_v29, 3  ;;  %v513_v3 = vrot.slane %v505_v41, 1  ;;  %v525_v4 = vmul.f32 %v742_v38, %v738_v36  ;;  %v767_v6 = vrot.slane %v211_v22, %v285_v56 }
   0xf   :  { %614 = vmatmul.mubr.msk.f32.gmra.mrb[2].mxu0 %vm34_vm0, %v21_v18  ;;  %v479_v61 = vadd.f32 %v471_v54, %v459_v53  ;;  %v539_v1 = vadd.f32 %v531_v58, %v519_v57  ;;  %v440_v7 = vmul.f32 %v748_v42, %v204_v48  ;;  %v770_v8 = vrot.slane %v212_v25, %v221_v27 }
  0x10   :  { %616 = vmatmul.mubr.msk.f32.gmra.mrb[2].mxu1 %vm34_vm0, %v21_v18  ;;  %v481_v10 = vadd.f32 %v473_v63, %v461_v59  ;;  %v452_v13 = vrot.slane %v444_v60, 1  ;;  %v464_v14 = vmul.f32 %v767_v6, %v204_v48  ;;  %v776_v15 = vrot.slane %v212_v25, %v245_v28 }
  0x11   :  { %v495_v5 = vadd.f32 %v487_v62, %v479_v61  ;;  %v555_v9 = vadd.f32 %v547_v2, %v539_v1  ;;  %v778_v16 = vrot.slane %v212_v25, %v285_v56  ;;  %v521_v18 = vadd.f32 %v513_v3, %v501_v0 }
  0x12   :  { %v533_v19 = vrot.slane %v525_v4, 2  ;;  %v460_v20 = vadd.f32 %v452_v13, %v440_v7  ;;  %v472_v22 = vrot.slane %v464_v14, 2  ;;  %v488_v23 = vrot.slane %v204_v48, 3 }
  0x13   :  { %v563_v17 = vrot.slane %v495_v5, 3  ;;  %v500_v24 = vmul.f32 %v748_v42, %v208_v12  ;;  %v504_v26 = vmul.f32 %v750_v43, %v208_v12  ;;  %v575_v27 = vrot.slane %v555_v9, 6 }
  0x14   :  { %v497_v29 = vadd.f32 %v489_v11, %v481_v10  ;;  %v549_v28 = vrot.slane %v738_v36, 3  ;;  %v524_v25 = vmul.f32 %v767_v6, %v208_v12  ;;  %v480_v34 = vadd.f32 %v472_v22, %v460_v20 }
  0x15   :  { %v512_v35 = vrot.slane %v504_v26, 1  ;;  %v442_v40 = vmul.f32 %v770_v8, %v206_v21  ;;  %v446_v41 = vmul.f32 %v776_v15, %v206_v21  ;;  %v583_v44 = vsel %vm419_vm1, %v495_v5, %v563_v17 }
  0x16   :  { %v541_v45 = vadd.f32 %v533_v19, %v521_v18  ;;  %v532_v46 = vrot.slane %v524_v25, 2  ;;  %v466_v47 = vmul.f32 %v778_v16, %v206_v21  ;;  %v496_v48 = vadd.f32 %v488_v23, %v480_v34 }
  0x17   :  { %v520_v36 = vadd.f32 %v512_v35, %v500_v24  ;;  %v548_v49 = vrot.slane %v208_v12, 3  ;;  %v454_v50 = vrot.slane %v446_v41, 1  ;;  %v502_v52 = vmul.f32 %v770_v8, %v210_v39 }
  0x18   :  { %v474_v51 = vrot.slane %v466_v47, 2  ;;  %v506_v53 = vmul.f32 %v776_v15, %v210_v39  ;;  %v526_v54 = vmul.f32 %v778_v16, %v210_v39  ;;  %v564_v56 = vrot.slane %v496_v48, 3 }
  0x19   :  { %v540_v55 = vadd.f32 %v532_v46, %v520_v36  ;;  %v462_v57 = vadd.f32 %v454_v50, %v442_v40  ;;  %v490_v58 = vrot.slane %v206_v21, 3  ;;  %v557_v59 = vadd.f32 %v549_v28, %v541_v45 }
  0x1a   :  { %v514_v60 = vrot.slane %v506_v53, 1  ;;  %v534_v61 = vrot.slane %v526_v54, 2  ;;  %v565_v62 = vrot.slane %v497_v29, 3  ;;  %v584_v1 = vsel %vm419_vm1, %v496_v48, %v564_v56 }
  0x1b   :  { %v556_v63 = vadd.f32 %v548_v49, %v540_v55  ;;  %v482_v0 = vadd.f32 %v474_v51, %v462_v57  ;;  %v550_v3 = vrot.slane %v210_v39, 3  ;;  %v587_v7 = vsel %vm424_vm2, %v583_v44, %v575_v27 }
  0x1c   :  { %v522_v2 = vadd.f32 %v514_v60, %v502_v52  ;;  %v577_v9 = vrot.slane %v557_v59, 6  ;;  %v585_v11 = vsel %vm419_vm1, %v497_v29, %v565_v62 }
  0x1d   :  { %v576_v4 = vrot.slane %v556_v63, 6  ;;  %v498_v5 = vadd.f32 %v490_v58, %v482_v0 }
  0x1e   :  { %v542_v10 = vadd.f32 %v534_v61, %v522_v2  ;;  %v589_v20 = vsel %vm424_vm2, %v585_v11, %v577_v9 }
  0x1f   :  { %v566_v12 = vrot.slane %v498_v5, 3  ;;  %v588_v13 = vsel %vm424_vm2, %v584_v1, %v576_v4 }
  0x20   :  { %v558_v14 = vadd.f32 %v550_v3, %v542_v10  ;;  %v595_v17 = vcombine.low %v587_v7, %v588_v13 }
  0x21   :  { %v586_v18 = vsel %vm419_vm1, %v498_v5, %v566_v12 }
  0x22   :  { %v578_v19 = vrot.slane %v558_v14, 6  ;;  %599 = vst [vmem:[%s897_s6] sm:$0x77] %v595_v17 }
  0x24   :  { %v590_v21 = vsel %vm424_vm2, %v586_v18, %v578_v19 }
  0x25   :  { %v596_v22 = vcombine.low %v589_v20, %v590_v21 }
  0x27   :  { %600 = vst [vmem:[%s897_s6 + $0x8] sm:$0x77] %v596_v22 }
  0xde   :  { %v107_v23 = vpop.f32.mrb[0].mxu0 }
  0xdf   :  { %195 = vst [vmem:[%s898_s5] sm:$0xff] %v107_v23  ;;  %v259_v24 = vmul.f32 %v723_v30, %v107_v23  ;;  %v299_v26 = vmul.f32 %v729_v33, %v107_v23  ;;  %v184_v27 = vpop.f32.mrb[0].mxu1  ;;  %v109_v29 = vpop.f32.mrb[1].mxu0  ;;  %v235_v35 = vmul.f32 %v727_v32, %v107_v23  ;;  %v323_v57 = vrot.slane %v107_v23, 3 }
  0xe0   :  { %197 = vst [vmem:[%s898_s5 + $0x10] sm:$0xff] %v184_v27  ;;  %v261_v28 = vmul.f32 %v725_v31, %v184_v27  ;;  %v301_v25 = vmul.f32 %v742_v38, %v184_v27  ;;  %196 = vst [vmem:[%s898_s5 + $0x8] sm:$0xff] %v109_v29  ;;  %v823_v34 = vpop.f32.mrb[1].mxu1  ;;  %v260_v40 = vmul.f32 %v750_v43, %v109_v29  ;;  %v325_v0 = vrot.slane %v184_v27, 3 }
  0xe1   :  { %v267_v39 = vrot.slane %v259_v24, 1  ;;  %198 = vst [vmem:[%s898_s5 + $0x18] sm:$0xff] %v823_v34  ;;  %v307_v41 = vrot.slane %v299_v26, 2  ;;  %v237_v44 = vmul.f32 %v740_v37, %v184_v27  ;;  %v300_v46 = vmul.f32 %v767_v6, %v109_v29 }
  0xe2   :  { %v269_v45 = vrot.slane %v261_v28, 1  ;;  %v113_v47 = vpop.f32.mrb[2].mxu0  ;;  %v236_v36 = vmul.f32 %v748_v42, %v109_v29  ;;  %v268_v49 = vrot.slane %v260_v40, 1  ;;  %v262_v50 = vmul.f32 %v776_v15, %v823_v34 }
  0xe3   :  { %v275_v48 = vadd.f32 %v267_v39, %v235_v35  ;;  %199 = vst [vmem:[%s898_s5 + $0x20] sm:$0xff] %v113_v47  ;;  %v190_v51 = vpop.f32.mrb[2].mxu1  ;;  %v839_v52 = vpop.f32.mrb[3].mxu0  ;;  %v309_v54 = vrot.slane %v301_v25, 2  ;;  %v308_v61 = vrot.slane %v300_v46, 2  ;;  %v339_v62 = vmul.f32 %v723_v30, %v113_v47 }
  0xe4   :  { %v277_v53 = vadd.f32 %v269_v45, %v237_v44  ;;  %201 = vst [vmem:[%s898_s5 + $0x30] sm:$0xff] %v190_v51  ;;  %200 = vst [vmem:[%s898_s5 + $0x28] sm:$0xff] %v839_v52  ;;  %v848_v55 = vpop.f32.mrb[3].mxu1  ;;  %v276_v58 = vadd.f32 %v268_v49, %v236_v36  ;;  %v270_v59 = vrot.slane %v262_v50, 1  ;;  %v359_v63 = vmul.f32 %v729_v33, %v113_v47 }
  0xe5   :  { %v315_v56 = vadd.f32 %v307_v41, %v275_v48  ;;  %202 = vst [vmem:[%s898_s5 + $0x38] sm:$0xff] %v848_v55  ;;  %v238_v1 = vmul.f32 %v770_v8, %v823_v34  ;;  %v302_v2 = vmul.f32 %v778_v16, %v823_v34  ;;  %v335_v5 = vmul.f32 %v727_v32, %v113_v47 }
  0xe6   :  { %v317_v60 = vadd.f32 %v309_v54, %v277_v53  ;;  %v316_v4 = vadd.f32 %v308_v61, %v276_v58  ;;  %v347_v7 = vrot.slane %v339_v62, 1  ;;  %v324_v9 = vrot.slane %v109_v29, 3 }
  0xe7   :  { %v331_v3 = vadd.f32 %v323_v57, %v315_v56  ;;  %v278_v10 = vadd.f32 %v270_v59, %v238_v1  ;;  %v341_v11 = vmul.f32 %v725_v31, %v190_v51  ;;  %v367_v13 = vrot.slane %v359_v63, 2 }
  0xe8   :  { %v333_v12 = vadd.f32 %v325_v0, %v317_v60  ;;  %v355_v30 = vadd.f32 %v347_v7, %v335_v5  ;;  %v361_v33 = vmul.f32 %v742_v38, %v190_v51  ;;  %v310_v14 = vrot.slane %v302_v2, 2 }
  0xe9   :  { %v326_v17 = vrot.slane %v823_v34, 3  ;;  %v337_v18 = vmul.f32 %v740_v37, %v190_v51  ;;  %v349_v19 = vrot.slane %v341_v11, 1  ;;  %v399_v20 = vrot.slane %v331_v3, 3 }
  0xea   :  { %v332_v21 = vadd.f32 %v324_v9, %v316_v4  ;;  %v375_v22 = vadd.f32 %v367_v13, %v355_v30  ;;  %v383_v32 = vrot.slane %v113_v47, 3  ;;  %v369_v24 = vrot.slane %v361_v33, 2 }
  0xeb   :  { %v357_v23 = vadd.f32 %v349_v19, %v337_v18  ;;  %v340_v31 = vmul.f32 %v750_v43, %v839_v52  ;;  %v360_v26 = vmul.f32 %v767_v6, %v839_v52  ;;  %v401_v27 = vrot.slane %v333_v12, 3 }
  0xec   :  { %v318_v38 = vadd.f32 %v310_v14, %v278_v10  ;;  %v391_v29 = vadd.f32 %v383_v32, %v375_v22  ;;  %v385_v28 = vrot.slane %v190_v51, 3  ;;  %v336_v37 = vmul.f32 %v748_v42, %v839_v52 }
  0xed   :  { %v377_v25 = vadd.f32 %v369_v24, %v357_v23  ;;  %v348_v34 = vrot.slane %v340_v31, 1  ;;  %v342_v35 = vmul.f32 %v776_v15, %v848_v55  ;;  %v420_v39 = vsel %vm419_vm1, %v331_v3, %v399_v20 }
  0xee   :  { %v411_v40 = vrot.slane %v391_v29, 6  ;;  %v338_v43 = vmul.f32 %v770_v8, %v848_v55  ;;  %v362_v6 = vmul.f32 %v778_v16, %v848_v55  ;;  %v368_v45 = vrot.slane %v360_v26, 2 }
  0xef   :  { %v393_v41 = vadd.f32 %v385_v28, %v377_v25  ;;  %v356_v44 = vadd.f32 %v348_v34, %v336_v37  ;;  %v350_v46 = vrot.slane %v342_v35, 1  ;;  %v334_v47 = vadd.f32 %v326_v17, %v318_v38 }
  0xf0   :  { %v384_v42 = vrot.slane %v839_v52, 3  ;;  %v425_v48 = vsel %vm424_vm2, %v420_v39, %v411_v40  ;;  %v370_v50 = vrot.slane %v362_v6, 2  ;;  %v422_v51 = vsel %vm419_vm1, %v333_v12, %v401_v27 }
  0xf1   :  { %v413_v36 = vrot.slane %v393_v41, 6  ;;  %v376_v15 = vadd.f32 %v368_v45, %v356_v44  ;;  %v358_v49 = vadd.f32 %v350_v46, %v338_v43  ;;  %v400_v53 = vrot.slane %v332_v21, 3 }
  0xf2   :  { %v386_v16 = vrot.slane %v848_v55, 3  ;;  %v402_v57 = vrot.slane %v334_v47, 3 }
  0xf3   :  { %v392_v8 = vadd.f32 %v384_v42, %v376_v15  ;;  %v378_v54 = vadd.f32 %v370_v50, %v358_v49  ;;  %v427_v56 = vsel %vm424_vm2, %v422_v51, %v413_v36  ;;  %v421_v52 = vsel %vm419_vm1, %v332_v21, %v400_v53 }
  0xf4   :  { %v423_v63 = vsel %vm419_vm1, %v334_v47, %v402_v57 }
  0xf5   :  { %v412_v58 = vrot.slane %v392_v8, 6  ;;  %v394_v59 = vadd.f32 %v386_v16, %v378_v54 }
  0xf7   :  { %v426_v60 = vsel %vm424_vm2, %v421_v52, %v412_v58  ;;  %v414_v61 = vrot.slane %v394_v59, 6 }
  0xf8   :  { %v433_v62 = vcombine.low %v425_v48, %v426_v60 }
  0xf9   :  { %v428_v0 = vsel %vm424_vm2, %v423_v63, %v414_v61 }
  0xfa   :  { %437 = vst [vmem:[%s899_s4] sm:$0x77] %v433_v62  ;;  %v434_v55 = vcombine.low %v427_v56, %v428_v0 }
  0xfc   :  { %438 = vst [vmem:[%s899_s4 + $0x8] sm:$0x77] %v434_v55 }

// kernel: _lbs_core.2
= control target key start
LH: loop header
LB: loop body
LE: loop exit
PB: predicated region body
PF: predicated region fallthrough
CT: control target
= control target key end

     0   :  { %vm88_vm0 = vcmask 1044480   ;;  %v2240_v1 = vmov 0   ;;  %vm84_vm1 = vcmask 80896   ;;  %v2241_v38 = vmov 1966171168   ;;  %s2878_s3 = inlined_call_operand.vmem [shape: bf16[10,1536], index: 3, kind: input, shape index: {}]   ;;  %s2879_s0 = inlined_call_operand.vmem [shape: bf16[1,10], index: 0, kind: input, shape index: {}]   ;;  %s2880_s4 = inlined_call_operand.vmem [shape: bf16[207,1536], index: 4, kind: input, shape index: {}]   ;;  %s2881_s1 = inlined_call_operand.vmem [shape: bf16[1,207], index: 1, kind: input, shape index: {}]   ;;  %s2882_s2 = inlined_call_operand.vmem [shape: f32[1,1536], index: 2, kind: input, shape index: {}]   ;;  %s2883_s5 = inlined_call_operand.vmem [shape: f32[1,1536], index: 5, kind: output, shape index: {}]  }
   0x1   :  { %v1988_v0 = vld [vmem:[%s2878_s3 + $0x4] ss:$48 sps:$4 sm:$0x1f]   ;;  %157 = vmatprep.mubr.bf16.mxu0 %v2240_v1  ;;  %198 = vmatprep.mubr.bf16.mxu1 %v2240_v1  ;;  %v1990_v2 = vld [vmem:[%s2878_s3 + $0xc] ss:$48 sps:$4 sm:$0x1f]   ;;  %v388_v39 = vunpack.c.l.s4 %v2241_v38  ;;  %v390_v40 = vlaneseq }
   0x2   :  { %1810 = vmatprep.subr.msk.bf16.mxu0 %vm88_vm0, %v1988_v0  ;;  %v1992_v3 = vld [vmem:[%s2878_s3] ss:$48 sps:$4 sm:$0x1f]   ;;  %v1993_v4 = vld [vmem:[%s2878_s3 + $0x8] ss:$48 sps:$4 sm:$0x1f]   ;;  %1812 = vmatprep.subr.msk.bf16.mxu1 %vm88_vm0, %v1990_v2 }
   0x3   :  { %v23_v5 = vld [vmem:[%s2879_s0] sm:$0x1]  ;;  %v90_v6 = vsel %vm88_vm0, %v1992_v3, 0  ;;  %v96_v7 = vsel %vm88_vm0, %v1993_v4, 0  ;;  %v2008_v20 = vld [vmem:[%s2880_s4 + $0x4] ss:$48 sps:$4 sm:$0xff]   ;;  %v389_v45 = vunpack.c.0.s8 %v388_v39 }
   0x4   :  { %v1994_v8 = vld [vmem:[%s2878_s3 + $0x14] ss:$48 sps:$4 sm:$0x1f]   ;;  %126 = vmatpush1.bf16.msra.mxu0 %v90_v6  ;;  %167 = vmatpush1.bf16.msra.mxu1 %v96_v7  ;;  %v1996_v9 = vld [vmem:[%s2878_s3 + $0x1c] ss:$48 sps:$4 sm:$0x1f]  }
   0x5   :  { %1814 = vmatprep.subr.msk.bf16.mxu0 %vm88_vm0, %v1994_v8  ;;  %v1998_v10 = vld [vmem:[%s2878_s3 + $0x10] ss:$48 sps:$4 sm:$0x1f]   ;;  %v1999_v11 = vld [vmem:[%s2878_s3 + $0x18] ss:$48 sps:$4 sm:$0x1f]   ;;  %1816 = vmatprep.subr.msk.bf16.mxu1 %vm88_vm0, %v1996_v9 }
   0x6   :  { %v2000_v12 = vld [vmem:[%s2878_s3 + $0x24] ss:$48 sps:$4 sm:$0x1f]   ;;  %v102_v13 = vsel %vm88_vm0, %v1998_v10, 0  ;;  %v108_v14 = vsel %vm88_vm0, %v1999_v11, 0  ;;  %v391_v46 = vshrl.u32 %v390_v40, 7 }
   0x7   :  { %1811 = vmatmul.mubr.msk.bf16.vlgmr.msra.gmra.mrb[0].mxu0 %vm84_vm1, %v23_v5  ;;  %1813 = vmatmul.mubr.msk.bf16.vlgmr.msra.gmra.mrb[0].mxu1 %vm84_vm1, %v23_v5  ;;  %v2002_v15 = vld [vmem:[%s2878_s3 + $0x2c] ss:$48 sps:$4 sm:$0x1f]   ;;  %v2004_v16 = vld [vmem:[%s2878_s3 + $0x20] ss:$48 sps:$4 sm:$0x1f]  }
   0x8   :  { %208 = vmatpush1.bf16.msra.mxu0 %v102_v13  ;;  %249 = vmatpush1.bf16.msra.mxu1 %v108_v14  ;;  %v2005_v17 = vld [vmem:[%s2878_s3 + $0x28] ss:$48 sps:$4 sm:$0x1f]   ;;  %v114_v18 = vsel %vm88_vm0, %v2004_v16, 0  ;;  %v2011_v21 = vld [vmem:[%s2880_s4 + $0xc] ss:$48 sps:$4 sm:$0xff]   ;;  %v2412_v52 = vsub.s32 %v389_v45, %v391_v46 }
   0x9   :  { %239 = vmatprep.mubr.bf16.mxu0 %v2240_v1  ;;  %280 = vmatprep.mubr.bf16.mxu1 %v2240_v1  ;;  %v120_v19 = vsel %vm88_vm0, %v2005_v17, 0  ;;  %v2006_v22 = vld [vmem:[%s2880_s4] ss:$48 sps:$4 sm:$0xff]   ;;  %v2009_v23 = vld [vmem:[%s2880_s4 + $0x8] ss:$48 sps:$4 sm:$0xff]   ;;  %vm1409_vm2 = vcmask 646144  }
   0xa   :  { %1818 = vmatprep.subr.msk.bf16.mxu0 %vm88_vm0, %v2000_v12  ;;  %1820 = vmatprep.subr.msk.bf16.mxu1 %vm88_vm0, %v2002_v15  ;;  %v2014_v24 = vld [vmem:[%s2880_s4 + $0x64] ss:$48 sps:$4 sm:$0xff]   ;;  %v2017_v25 = vld [vmem:[%s2880_s4 + $0x6c] ss:$48 sps:$4 sm:$0xff]   ;;  %v2012_v26 = vld [vmem:[%s2880_s4 + $0x60] ss:$48 sps:$4 sm:$0xff]  }
   0xb   :  { %v2015_v27 = vld [vmem:[%s2880_s4 + $0x68] ss:$48 sps:$4 sm:$0xff]   ;;  %v2020_v28 = vld [vmem:[%s2880_s4 + $0xc4] ss:$48 sps:$4 sm:$0xff]   ;;  %v2023_v29 = vld [vmem:[%s2880_s4 + $0xcc] ss:$48 sps:$4 sm:$0xff]  }
   0xc   :  { %v2018_v30 = vld [vmem:[%s2880_s4 + $0xc0] ss:$48 sps:$4 sm:$0xff]   ;;  %v2021_v31 = vld [vmem:[%s2880_s4 + $0xc8] ss:$48 sps:$4 sm:$0xff]   ;;  %v2026_v32 = vld [vmem:[%s2880_s4 + $0x124] ss:$48 sps:$4 sm:$0xff]  }
   0xd   :  { %v2029_v33 = vld [vmem:[%s2880_s4 + $0x12c] ss:$48 sps:$4 sm:$0xff]   ;;  %v2024_v34 = vld [vmem:[%s2880_s4 + $0x120] ss:$48 sps:$4 sm:$0xff]   ;;  %v2027_v35 = vld [vmem:[%s2880_s4 + $0x128] ss:$48 sps:$4 sm:$0xff]  }
   0xe   :  { %v2032_v36 = vld [vmem:[%s2880_s4 + $0x184] ss:$48 sps:$4 sm:$0xff]   ;;  %v2035_v37 = vld [vmem:[%s2880_s4 + $0x18c] ss:$48 sps:$4 sm:$0xff]   ;;  %v2030_v41 = vld [vmem:[%s2880_s4 + $0x180] ss:$48 sps:$4 sm:$0xff]  }
   0xf   :  { %1815 = vmatmul.mubr.msk.bf16.vlgmr.msra.gmra.mrb[4].mxu0 %vm84_vm1, %v23_v5  ;;  %1817 = vmatmul.mubr.msk.bf16.vlgmr.msra.gmra.mrb[4].mxu1 %vm84_vm1, %v23_v5  ;;  %v2033_v42 = vld [vmem:[%s2880_s4 + $0x188] ss:$48 sps:$4 sm:$0xff]   ;;  %v2038_v43 = vld [vmem:[%s2880_s4 + $0x1e4] ss:$48 sps:$4 sm:$0xff]   ;;  %v2041_v44 = vld [vmem:[%s2880_s4 + $0x1ec] ss:$48 sps:$4 sm:$0xff]  }
  0x10   :  { %290 = vmatpush1.bf16.msra.mxu0 %v114_v18  ;;  %331 = vmatpush1.bf16.msra.mxu1 %v120_v19  ;;  %v2036_v47 = vld [vmem:[%s2880_s4 + $0x1e0] ss:$48 sps:$4 sm:$0xff]   ;;  %v2039_v48 = vld [vmem:[%s2880_s4 + $0x1e8] ss:$48 sps:$4 sm:$0xff]   ;;  %v2044_v49 = vld [vmem:[%s2880_s4 + $0x244] ss:$48 sps:$4 sm:$0xff]  }
  0x11   :  { %321 = vmatprep.mubr.bf16.mxu0 %v2240_v1  ;;  %362 = vmatprep.mubr.bf16.mxu1 %v2240_v1  ;;  %v2047_v50 = vld [vmem:[%s2880_s4 + $0x24c] ss:$48 sps:$4 sm:$0xff]   ;;  %v2042_v51 = vld [vmem:[%s2880_s4 + $0x240] ss:$48 sps:$4 sm:$0xff]   ;;  %v2045_v53 = vld [vmem:[%s2880_s4 + $0x248] ss:$48 sps:$4 sm:$0xff]  }
  0x12   :  { %1453 = vmatprep.subr.bf16.mxu0 %v2008_v20  ;;  %1494 = vmatprep.subr.bf16.mxu1 %v2011_v21  ;;  %v2420_v54 = vld.sshfl [vmem:[%s2881_s1] sm:$0x11 pattern:$0x75316420]  ;;  %v2050_v55 = vld [vmem:[%s2880_s4 + $0x2a4] ss:$48 sps:$4 sm:$0xff]  }
  0x13   :  { %v625_v56 = vcombine.high %v2420_v54, %v2420_v54  ;;  %v2053_v57 = vld [vmem:[%s2880_s4 + $0x2ac] ss:$48 sps:$4 sm:$0xff]   ;;  %v2048_v59 = vld [vmem:[%s2880_s4 + $0x2a0] ss:$48 sps:$4 sm:$0xff]   ;;  %v2051_v60 = vld [vmem:[%s2880_s4 + $0x2a8] ss:$48 sps:$4 sm:$0xff]  }
  0x14   :  { %v2056_v61 = vld [vmem:[%s2880_s4 + $0x304] ss:$48 sps:$4 sm:$0xff]   ;;  %v2059_v62 = vld [vmem:[%s2880_s4 + $0x30c] ss:$48 sps:$4 sm:$0xff]   ;;  %v2054_v63 = vld [vmem:[%s2880_s4 + $0x300] ss:$48 sps:$4 sm:$0xff]  }
  0x15   :  { %v2431_v58 = vrot.slane %v625_v56, %v2412_v52  ;;  %v2057_v0 = vld [vmem:[%s2880_s4 + $0x308] ss:$48 sps:$4 sm:$0xff]   ;;  %v2062_v1 = vld [vmem:[%s2880_s4 + $0x364] ss:$48 sps:$4 sm:$0xff]   ;;  %v2065_v2 = vld [vmem:[%s2880_s4 + $0x36c] ss:$48 sps:$4 sm:$0xff]  }
  0x16   :  { %v2060_v3 = vld [vmem:[%s2880_s4 + $0x360] ss:$48 sps:$4 sm:$0xff]   ;;  %v2063_v4 = vld [vmem:[%s2880_s4 + $0x368] ss:$48 sps:$4 sm:$0xff]   ;;  %vm1413_vm3 = vcmask 1046528   ;;  %vm1414_vm4 = vcmask 1047552  }
  0x17   :  { %1819 = vmatmul.mubr.msk.bf16.vlgmr.msra.gmra.mrb[8].mxu0 %vm84_vm1, %v23_v5  ;;  %1821 = vmatmul.mubr.msk.bf16.vlgmr.msra.gmra.mrb[8].mxu1 %vm84_vm1, %v23_v5  ;;  %v2068_v5 = vld [vmem:[%s2880_s4 + $0x3c4] ss:$48 sps:$4 sm:$0xff]   ;;  %v2071_v6 = vld [vmem:[%s2880_s4 + $0x3cc] ss:$48 sps:$4 sm:$0xff]   ;;  %v2066_v7 = vld [vmem:[%s2880_s4 + $0x3c0] ss:$48 sps:$4 sm:$0xff]  }
  0x18   :  { %1454 = vmatpush1.bf16.msra.mxu0 %v2006_v22  ;;  %1495 = vmatpush1.bf16.msra.mxu1 %v2009_v23  ;;  %v2069_v8 = vld [vmem:[%s2880_s4 + $0x3c8] ss:$48 sps:$4 sm:$0xff]   ;;  %v2074_v9 = vld [vmem:[%s2880_s4 + $0x424] ss:$48 sps:$4 sm:$0xff]   ;;  %v2077_v10 = vld [vmem:[%s2880_s4 + $0x42c] ss:$48 sps:$4 sm:$0xff]  }
  0x19   :  { %1455 = vmatprep.subr.bf16.mxu0 %v2014_v24  ;;  %1496 = vmatprep.subr.bf16.mxu1 %v2017_v25  ;;  %v2242_v11 = vmov 65535   ;;  %v2080_v13 = vld [vmem:[%s2880_s4 + $0x484] ss:$48 sps:$4 sm:$0xff]   ;;  %v2083_v14 = vld [vmem:[%s2880_s4 + $0x48c] ss:$48 sps:$4 sm:$0xff]   ;;  %vm1791_vm5 = vcmp.lt.s32.totalorder %v390_v40, 512 }
  0x1a   :  { %1979 = vmatprep.mubr.msk.bf16.mxu0 %vm1409_vm2, %v2431_v58  ;;  %1980 = vmatprep.mubr.msk.bf16.mxu1 %vm1409_vm2, %v2431_v58  ;;  %v1415_v12 = vsel %vm1413_vm3, 4294967295, %v2242_v11  ;;  %v2072_v15 = vld [vmem:[%s2880_s4 + $0x420] ss:$48 sps:$4 sm:$0xff]   ;;  %v2075_v17 = vld [vmem:[%s2880_s4 + $0x428] ss:$48 sps:$4 sm:$0xff]  }
  0x1b   :  { %v2494_v16 = vsel %vm1414_vm4, %v1415_v12, 0  ;;  %v2078_v18 = vld [vmem:[%s2880_s4 + $0x480] ss:$48 sps:$4 sm:$0xff]   ;;  %v2081_v19 = vld [vmem:[%s2880_s4 + $0x488] ss:$48 sps:$4 sm:$0xff]  }
  0x1c   :  { %1456 = vmatpush1.bf16.msra.mxu0 %v2012_v26  ;;  %1497 = vmatpush1.bf16.msra.mxu1 %v2015_v27  ;;  %v1421_v20 = vand.u32 %v2080_v13, %v2494_v16  ;;  %v1427_v21 = vand.u32 %v2083_v14, %v2494_v16  ;;  %v1418_v22 = vand.u32 %v2078_v18, %v2494_v16  ;;  %v2086_v24 = vld [vmem:[%s2880_s4 + $0x14] ss:$48 sps:$4 sm:$0xff]   ;;  %v2089_v25 = vld [vmem:[%s2880_s4 + $0x1c] ss:$48 sps:$4 sm:$0xff]   ;;  %v2084_v27 = vld [vmem:[%s2880_s4 + $0x10] ss:$48 sps:$4 sm:$0xff]  }
  0x1d   :  { %1457 = vmatprep.subr.bf16.mxu0 %v2020_v28  ;;  %1498 = vmatprep.subr.bf16.mxu1 %v2023_v29  ;;  %v1424_v23 = vand.u32 %v2081_v19, %v2494_v16  ;;  %v2517_v26 = vrot.slane %v2420_v54, %v2412_v52  ;;  %v2087_v28 = vld [vmem:[%s2880_s4 + $0x18] ss:$48 sps:$4 sm:$0xff]   ;;  %v2092_v29 = vld [vmem:[%s2880_s4 + $0x74] ss:$48 sps:$4 sm:$0xff]   ;;  %v2107_v38 = vld [vmem:[%s2880_s4 + $0x13c] ss:$48 sps:$4 sm:$0xff]  }
  0x1e   :  { %v2102_v39 = vld [vmem:[%s2880_s4 + $0x130] ss:$48 sps:$4 sm:$0xff]   ;;  %v2111_v45 = vld [vmem:[%s2880_s4 + $0x198] ss:$48 sps:$4 sm:$0xff]   ;;  %v2116_v46 = vld [vmem:[%s2880_s4 + $0x1f4] ss:$48 sps:$4 sm:$0xff]  }
  0x1f   :  { %v2123_v54 = vld [vmem:[%s2880_s4 + $0x258] ss:$48 sps:$4 sm:$0xff]   ;;  %v2131_v56 = vld [vmem:[%s2880_s4 + $0x2bc] ss:$48 sps:$4 sm:$0xff]   ;;  %v2150_v12 = vld [vmem:[%s2880_s4 + $0x430] ss:$48 sps:$4 sm:$0xff]  }
  0x20   :  { %1458 = vmatpush1.bf16.msra.mxu0 %v2018_v30  ;;  %1499 = vmatpush1.bf16.msra.mxu1 %v2021_v31  ;;  %v2095_v30 = vld [vmem:[%s2880_s4 + $0x7c] ss:$48 sps:$4 sm:$0xff]   ;;  %v2090_v31 = vld [vmem:[%s2880_s4 + $0x70] ss:$48 sps:$4 sm:$0xff]   ;;  %v2153_v13 = vld [vmem:[%s2880_s4 + $0x438] ss:$48 sps:$4 sm:$0xff]  }
  0x21   :  { %1459 = vmatprep.subr.bf16.mxu0 %v2026_v32  ;;  %1500 = vmatprep.subr.bf16.mxu1 %v2029_v33  ;;  %v2093_v32 = vld [vmem:[%s2880_s4 + $0x78] ss:$48 sps:$4 sm:$0xff]   ;;  %v2098_v33 = vld [vmem:[%s2880_s4 + $0xd4] ss:$48 sps:$4 sm:$0xff]   ;;  %v2161_v11 = vld [vmem:[%s2880_s4 + $0x49c] ss:$48 sps:$4 sm:$0xff]  }
  0x22   :  { %v2156_v14 = vld [vmem:[%s2880_s4 + $0x490] ss:$48 sps:$4 sm:$0xff]   ;;  %v1439_v18 = vand.u32 %v2161_v11, %v2494_v16  ;;  %v2237_v11 = vld [vmem:[%s2880_s4 + $0x4a8] ss:$48 sps:$4 sm:$0xff]  }
  0x23   :  { %v1430_v19 = vand.u32 %v2156_v14, %v2494_v16 }
  0x24   :  { %1460 = vmatpush1.bf16.msra.mxu0 %v2024_v34  ;;  %1501 = vmatpush1.bf16.msra.mxu1 %v2027_v35  ;;  %v2101_v34 = vld [vmem:[%s2880_s4 + $0xdc] ss:$48 sps:$4 sm:$0xff]   ;;  %v2096_v35 = vld [vmem:[%s2880_s4 + $0xd0] ss:$48 sps:$4 sm:$0xff]  }
  0x25   :  { %1461 = vmatprep.subr.bf16.mxu0 %v2032_v36  ;;  %1502 = vmatprep.subr.bf16.mxu1 %v2035_v37  ;;  %v2099_v36 = vld [vmem:[%s2880_s4 + $0xd8] ss:$48 sps:$4 sm:$0xff]   ;;  %v2104_v37 = vld [vmem:[%s2880_s4 + $0x134] ss:$48 sps:$4 sm:$0xff]  }
  0x28   :  { %1462 = vmatpush1.bf16.msra.mxu0 %v2030_v41  ;;  %1503 = vmatpush1.bf16.msra.mxu1 %v2033_v42  ;;  %v2105_v41 = vld [vmem:[%s2880_s4 + $0x138] ss:$48 sps:$4 sm:$0xff]   ;;  %v2110_v42 = vld [vmem:[%s2880_s4 + $0x194] ss:$48 sps:$4 sm:$0xff]  }
  0x29   :  { %1463 = vmatprep.subr.bf16.mxu0 %v2038_v43  ;;  %1504 = vmatprep.subr.bf16.mxu1 %v2041_v44  ;;  %v2113_v43 = vld [vmem:[%s2880_s4 + $0x19c] ss:$48 sps:$4 sm:$0xff]   ;;  %v2108_v44 = vld [vmem:[%s2880_s4 + $0x190] ss:$48 sps:$4 sm:$0xff]  }
  0x2c   :  { %1464 = vmatpush1.bf16.msra.mxu0 %v2036_v47  ;;  %1505 = vmatpush1.bf16.msra.mxu1 %v2039_v48  ;;  %v2119_v47 = vld [vmem:[%s2880_s4 + $0x1fc] ss:$48 sps:$4 sm:$0xff]   ;;  %v2114_v48 = vld [vmem:[%s2880_s4 + $0x1f0] ss:$48 sps:$4 sm:$0xff]  }
  0x2d   :  { %1465 = vmatprep.subr.bf16.mxu0 %v2044_v49  ;;  %1506 = vmatprep.subr.bf16.mxu1 %v2047_v50  ;;  %v2117_v49 = vld [vmem:[%s2880_s4 + $0x1f8] ss:$48 sps:$4 sm:$0xff]   ;;  %v2122_v50 = vld [vmem:[%s2880_s4 + $0x254] ss:$48 sps:$4 sm:$0xff]  }
  0x30   :  { %1466 = vmatpush1.bf16.msra.mxu0 %v2042_v51  ;;  %1507 = vmatpush1.bf16.msra.mxu1 %v2045_v53  ;;  %v2125_v51 = vld [vmem:[%s2880_s4 + $0x25c] ss:$48 sps:$4 sm:$0xff]   ;;  %v2120_v53 = vld [vmem:[%s2880_s4 + $0x250] ss:$48 sps:$4 sm:$0xff]  }
  0x31   :  { %1467 = vmatprep.subr.bf16.mxu0 %v2050_v55  ;;  %1508 = vmatprep.subr.bf16.mxu1 %v2053_v57  ;;  %v2128_v55 = vld [vmem:[%s2880_s4 + $0x2b4] ss:$48 sps:$4 sm:$0xff]   ;;  %v2126_v57 = vld [vmem:[%s2880_s4 + $0x2b0] ss:$48 sps:$4 sm:$0xff]  }
  0x34   :  { %1468 = vmatpush1.bf16.msra.mxu0 %v2048_v59  ;;  %1509 = vmatpush1.bf16.msra.mxu1 %v2051_v60  ;;  %v2129_v59 = vld [vmem:[%s2880_s4 + $0x2b8] ss:$48 sps:$4 sm:$0xff]   ;;  %v2134_v60 = vld [vmem:[%s2880_s4 + $0x314] ss:$48 sps:$4 sm:$0xff]  }
  0x35   :  { %1469 = vmatprep.subr.bf16.mxu0 %v2056_v61  ;;  %1510 = vmatprep.subr.bf16.mxu1 %v2059_v62  ;;  %v2137_v61 = vld [vmem:[%s2880_s4 + $0x31c] ss:$48 sps:$4 sm:$0xff]   ;;  %v2132_v62 = vld [vmem:[%s2880_s4 + $0x310] ss:$48 sps:$4 sm:$0xff]  }
  0x38   :  { %1470 = vmatpush1.bf16.msra.mxu0 %v2054_v63  ;;  %1511 = vmatpush1.bf16.msra.mxu1 %v2057_v0  ;;  %v2135_v63 = vld [vmem:[%s2880_s4 + $0x318] ss:$48 sps:$4 sm:$0xff]   ;;  %v2140_v0 = vld [vmem:[%s2880_s4 + $0x374] ss:$48 sps:$4 sm:$0xff]  }
  0x39   :  { %1471 = vmatprep.subr.bf16.mxu0 %v2062_v1  ;;  %1512 = vmatprep.subr.bf16.mxu1 %v2065_v2  ;;  %v2143_v1 = vld [vmem:[%s2880_s4 + $0x37c] ss:$48 sps:$4 sm:$0xff]   ;;  %v2138_v2 = vld [vmem:[%s2880_s4 + $0x370] ss:$48 sps:$4 sm:$0xff]  }
  0x3c   :  { %1472 = vmatpush1.bf16.msra.mxu0 %v2060_v3  ;;  %1513 = vmatpush1.bf16.msra.mxu1 %v2063_v4  ;;  %v2141_v3 = vld [vmem:[%s2880_s4 + $0x378] ss:$48 sps:$4 sm:$0xff]   ;;  %v2146_v4 = vld [vmem:[%s2880_s4 + $0x3d4] ss:$48 sps:$4 sm:$0xff]  }
  0x3d   :  { %1473 = vmatprep.subr.bf16.mxu0 %v2068_v5  ;;  %1514 = vmatprep.subr.bf16.mxu1 %v2071_v6  ;;  %v2149_v5 = vld [vmem:[%s2880_s4 + $0x3dc] ss:$48 sps:$4 sm:$0xff]   ;;  %v2144_v6 = vld [vmem:[%s2880_s4 + $0x3d0] ss:$48 sps:$4 sm:$0xff]  }
  0x40   :  { %1474 = vmatpush1.bf16.msra.mxu0 %v2066_v7  ;;  %1515 = vmatpush1.bf16.msra.mxu1 %v2069_v8  ;;  %v2147_v7 = vld [vmem:[%s2880_s4 + $0x3d8] ss:$48 sps:$4 sm:$0xff]   ;;  %v2152_v8 = vld [vmem:[%s2880_s4 + $0x434] ss:$48 sps:$4 sm:$0xff]  }
  0x41   :  { %1475 = vmatprep.subr.bf16.mxu0 %v2074_v9  ;;  %1516 = vmatprep.subr.bf16.mxu1 %v2077_v10  ;;  %v2155_v9 = vld [vmem:[%s2880_s4 + $0x43c] ss:$48 sps:$4 sm:$0xff]   ;;  %v2158_v10 = vld [vmem:[%s2880_s4 + $0x494] ss:$48 sps:$4 sm:$0xff]  }
  0x44   :  { %1476 = vmatpush1.bf16.msra.mxu0 %v2072_v15  ;;  %1517 = vmatpush1.bf16.msra.mxu1 %v2075_v17  ;;  %v2159_v15 = vld [vmem:[%s2880_s4 + $0x498] ss:$48 sps:$4 sm:$0xff]   ;;  %v1433_v17 = vand.u32 %v2158_v10, %v2494_v16  ;;  %v2234_v10 = vld [vmem:[%s2880_s4 + $0x4a0] ss:$48 sps:$4 sm:$0xff]  }
  0x45   :  { %1477 = vmatprep.subr.bf16.mxu0 %v1421_v20  ;;  %1518 = vmatprep.subr.bf16.mxu1 %v1427_v21  ;;  %v1436_v20 = vand.u32 %v2159_v15, %v2494_v16  ;;  %v2164_v21 = vld [vmem:[%s2880_s4 + $0x24] ss:$48 sps:$4 sm:$0xff]   ;;  %v1442_v14 = vand.u32 %v2234_v10, %v2494_v16  ;;  %v1448_v15 = vand.u32 %v2237_v11, %v2494_v16 }
  0x48   :  { %1478 = vmatpush1.bf16.msra.mxu0 %v1418_v22  ;;  %1519 = vmatpush1.bf16.msra.mxu1 %v1424_v23  ;;  %v2167_v22 = vld [vmem:[%s2880_s4 + $0x2c] ss:$48 sps:$4 sm:$0xff]   ;;  %v2162_v23 = vld [vmem:[%s2880_s4 + $0x20] ss:$48 sps:$4 sm:$0xff]  }
  0x49   :  { %1535 = vmatprep.subr.bf16.mxu0 %v2086_v24  ;;  %1576 = vmatprep.subr.bf16.mxu1 %v2089_v25  ;;  %v2165_v24 = vld [vmem:[%s2880_s4 + $0x28] ss:$48 sps:$4 sm:$0xff]   ;;  %v2170_v25 = vld [vmem:[%s2880_s4 + $0x84] ss:$48 sps:$4 sm:$0xff]  }
  0x4b   :  { %1486 = vmatmul.mubr.bf16.vlgmr.msra.gmra.mrb[12].mxu0 %v2517_v26  ;;  %1527 = vmatmul.mubr.bf16.vlgmr.msra.gmra.mrb[12].mxu1 %v2517_v26 }
  0x4c   :  { %1536 = vmatpush1.bf16.msra.mxu0 %v2084_v27  ;;  %1577 = vmatpush1.bf16.msra.mxu1 %v2087_v28  ;;  %v2173_v27 = vld [vmem:[%s2880_s4 + $0x8c] ss:$48 sps:$4 sm:$0xff]   ;;  %v2168_v28 = vld [vmem:[%s2880_s4 + $0x80] ss:$48 sps:$4 sm:$0xff]  }
  0x4d   :  { %1537 = vmatprep.subr.bf16.mxu0 %v2092_v29  ;;  %1578 = vmatprep.subr.bf16.mxu1 %v2095_v30  ;;  %v2171_v29 = vld [vmem:[%s2880_s4 + $0x88] ss:$48 sps:$4 sm:$0xff]   ;;  %v2176_v30 = vld [vmem:[%s2880_s4 + $0xe4] ss:$48 sps:$4 sm:$0xff]  }
  0x4e   :  { %1981 = vmatprep.mubr.msk.bf16.mxu0 %vm1409_vm2, %v2431_v58  ;;  %1982 = vmatprep.mubr.msk.bf16.mxu1 %vm1409_vm2, %v2431_v58 }
  0x50   :  { %1538 = vmatpush1.bf16.msra.mxu0 %v2090_v31  ;;  %1579 = vmatpush1.bf16.msra.mxu1 %v2093_v32  ;;  %v2179_v31 = vld [vmem:[%s2880_s4 + $0xec] ss:$48 sps:$4 sm:$0xff]   ;;  %v2174_v32 = vld [vmem:[%s2880_s4 + $0xe0] ss:$48 sps:$4 sm:$0xff]  }
  0x51   :  { %1539 = vmatprep.subr.bf16.mxu0 %v2098_v33  ;;  %1580 = vmatprep.subr.bf16.mxu1 %v2101_v34  ;;  %v2177_v33 = vld [vmem:[%s2880_s4 + $0xe8] ss:$48 sps:$4 sm:$0xff]   ;;  %v2182_v34 = vld [vmem:[%s2880_s4 + $0x144] ss:$48 sps:$4 sm:$0xff]  }
  0x54   :  { %1540 = vmatpush1.bf16.msra.mxu0 %v2096_v35  ;;  %1581 = vmatpush1.bf16.msra.mxu1 %v2099_v36  ;;  %v2180_v35 = vld [vmem:[%s2880_s4 + $0x140] ss:$48 sps:$4 sm:$0xff]   ;;  %v2183_v36 = vld [vmem:[%s2880_s4 + $0x148] ss:$48 sps:$4 sm:$0xff]  }
  0x55   :  { %1541 = vmatprep.subr.bf16.mxu0 %v2104_v37  ;;  %1582 = vmatprep.subr.bf16.mxu1 %v2107_v38  ;;  %v2188_v37 = vld [vmem:[%s2880_s4 + $0x1a4] ss:$48 sps:$4 sm:$0xff]   ;;  %v2191_v38 = vld [vmem:[%s2880_s4 + $0x1ac] ss:$48 sps:$4 sm:$0xff]  }
  0x58   :  { %1542 = vmatpush1.bf16.msra.mxu0 %v2102_v39  ;;  %1583 = vmatpush1.bf16.msra.mxu1 %v2105_v41  ;;  %v2186_v39 = vld [vmem:[%s2880_s4 + $0x1a0] ss:$48 sps:$4 sm:$0xff]   ;;  %v2189_v41 = vld [vmem:[%s2880_s4 + $0x1a8] ss:$48 sps:$4 sm:$0xff]  }
  0x59   :  { %1543 = vmatprep.subr.bf16.mxu0 %v2110_v42  ;;  %1584 = vmatprep.subr.bf16.mxu1 %v2113_v43  ;;  %v2194_v42 = vld [vmem:[%s2880_s4 + $0x204] ss:$48 sps:$4 sm:$0xff]   ;;  %v2197_v43 = vld [vmem:[%s2880_s4 + $0x20c] ss:$48 sps:$4 sm:$0xff]  }
  0x5c   :  { %1544 = vmatpush1.bf16.msra.mxu0 %v2108_v44  ;;  %1585 = vmatpush1.bf16.msra.mxu1 %v2111_v45  ;;  %v2192_v44 = vld [vmem:[%s2880_s4 + $0x200] ss:$48 sps:$4 sm:$0xff]   ;;  %v2195_v45 = vld [vmem:[%s2880_s4 + $0x208] ss:$48 sps:$4 sm:$0xff]  }
  0x5d   :  { %1545 = vmatprep.subr.bf16.mxu0 %v2116_v46  ;;  %1586 = vmatprep.subr.bf16.mxu1 %v2119_v47  ;;  %v2200_v46 = vld [vmem:[%s2880_s4 + $0x264] ss:$48 sps:$4 sm:$0xff]   ;;  %v2203_v47 = vld [vmem:[%s2880_s4 + $0x26c] ss:$48 sps:$4 sm:$0xff]  }
  0x60   :  { %1546 = vmatpush1.bf16.msra.mxu0 %v2114_v48  ;;  %1587 = vmatpush1.bf16.msra.mxu1 %v2117_v49  ;;  %v2198_v48 = vld [vmem:[%s2880_s4 + $0x260] ss:$48 sps:$4 sm:$0xff]   ;;  %v2201_v49 = vld [vmem:[%s2880_s4 + $0x268] ss:$48 sps:$4 sm:$0xff]  }
  0x61   :  { %1547 = vmatprep.subr.bf16.mxu0 %v2122_v50  ;;  %1588 = vmatprep.subr.bf16.mxu1 %v2125_v51  ;;  %v2206_v50 = vld [vmem:[%s2880_s4 + $0x2c4] ss:$48 sps:$4 sm:$0xff]   ;;  %v2209_v51 = vld [vmem:[%s2880_s4 + $0x2cc] ss:$48 sps:$4 sm:$0xff]  }
  0x64   :  { %1548 = vmatpush1.bf16.msra.mxu0 %v2120_v53  ;;  %1589 = vmatpush1.bf16.msra.mxu1 %v2123_v54  ;;  %v2204_v53 = vld [vmem:[%s2880_s4 + $0x2c0] ss:$48 sps:$4 sm:$0xff]   ;;  %v2207_v54 = vld [vmem:[%s2880_s4 + $0x2c8] ss:$48 sps:$4 sm:$0xff]  }
  0x65   :  { %1549 = vmatprep.subr.bf16.mxu0 %v2128_v55  ;;  %1590 = vmatprep.subr.bf16.mxu1 %v2131_v56  ;;  %v2212_v55 = vld [vmem:[%s2880_s4 + $0x324] ss:$48 sps:$4 sm:$0xff]   ;;  %v2215_v56 = vld [vmem:[%s2880_s4 + $0x32c] ss:$48 sps:$4 sm:$0xff]  }
  0x68   :  { %1550 = vmatpush1.bf16.msra.mxu0 %v2126_v57  ;;  %1591 = vmatpush1.bf16.msra.mxu1 %v2129_v59  ;;  %v2210_v57 = vld [vmem:[%s2880_s4 + $0x320] ss:$48 sps:$4 sm:$0xff]   ;;  %v2213_v59 = vld [vmem:[%s2880_s4 + $0x328] ss:$48 sps:$4 sm:$0xff]  }
  0x69   :  { %1551 = vmatprep.subr.bf16.mxu0 %v2134_v60  ;;  %1592 = vmatprep.subr.bf16.mxu1 %v2137_v61  ;;  %v2218_v60 = vld [vmem:[%s2880_s4 + $0x384] ss:$48 sps:$4 sm:$0xff]   ;;  %v2221_v61 = vld [vmem:[%s2880_s4 + $0x38c] ss:$48 sps:$4 sm:$0xff]  }
  0x6c   :  { %1552 = vmatpush1.bf16.msra.mxu0 %v2132_v62  ;;  %1593 = vmatpush1.bf16.msra.mxu1 %v2135_v63  ;;  %v2216_v62 = vld [vmem:[%s2880_s4 + $0x380] ss:$48 sps:$4 sm:$0xff]   ;;  %v2219_v63 = vld [vmem:[%s2880_s4 + $0x388] ss:$48 sps:$4 sm:$0xff]  }
  0x6d   :  { %1553 = vmatprep.subr.bf16.mxu0 %v2140_v0  ;;  %1594 = vmatprep.subr.bf16.mxu1 %v2143_v1  ;;  %v2224_v0 = vld [vmem:[%s2880_s4 + $0x3e4] ss:$48 sps:$4 sm:$0xff]   ;;  %v2227_v1 = vld [vmem:[%s2880_s4 + $0x3ec] ss:$48 sps:$4 sm:$0xff]  }
  0x70   :  { %1554 = vmatpush1.bf16.msra.mxu0 %v2138_v2  ;;  %1595 = vmatpush1.bf16.msra.mxu1 %v2141_v3  ;;  %v2222_v2 = vld [vmem:[%s2880_s4 + $0x3e0] ss:$48 sps:$4 sm:$0xff]   ;;  %v2225_v3 = vld [vmem:[%s2880_s4 + $0x3e8] ss:$48 sps:$4 sm:$0xff]  }
  0x71   :  { %1555 = vmatprep.subr.bf16.mxu0 %v2146_v4  ;;  %1596 = vmatprep.subr.bf16.mxu1 %v2149_v5  ;;  %v2230_v4 = vld [vmem:[%s2880_s4 + $0x444] ss:$48 sps:$4 sm:$0xff]   ;;  %v2233_v5 = vld [vmem:[%s2880_s4 + $0x44c] ss:$48 sps:$4 sm:$0xff]  }
  0x74   :  { %1556 = vmatpush1.bf16.msra.mxu0 %v2144_v6  ;;  %1597 = vmatpush1.bf16.msra.mxu1 %v2147_v7  ;;  %v2236_v6 = vld [vmem:[%s2880_s4 + $0x4a4] ss:$48 sps:$4 sm:$0xff]   ;;  %v2239_v7 = vld [vmem:[%s2880_s4 + $0x4ac] ss:$48 sps:$4 sm:$0xff]  }
  0x75   :  { %1557 = vmatprep.subr.bf16.mxu0 %v2152_v8  ;;  %1598 = vmatprep.subr.bf16.mxu1 %v2155_v9  ;;  %v2228_v8 = vld [vmem:[%s2880_s4 + $0x440] ss:$48 sps:$4 sm:$0xff]   ;;  %v2231_v9 = vld [vmem:[%s2880_s4 + $0x448] ss:$48 sps:$4 sm:$0xff]  }
  0x78   :  { %1558 = vmatpush1.bf16.msra.mxu0 %v2150_v12  ;;  %1599 = vmatpush1.bf16.msra.mxu1 %v2153_v13  ;;  %v1445_v12 = vand.u32 %v2236_v6, %v2494_v16  ;;  %v1451_v13 = vand.u32 %v2239_v7, %v2494_v16 }
  0x79   :  { %1559 = vmatprep.subr.bf16.mxu0 %v1433_v17  ;;  %1600 = vmatprep.subr.bf16.mxu1 %v1439_v18 }
  0x7c   :  { %1560 = vmatpush1.bf16.msra.mxu0 %v1430_v19  ;;  %1601 = vmatpush1.bf16.msra.mxu1 %v1436_v20 }
  0x7d   :  { %1617 = vmatprep.subr.bf16.mxu0 %v2164_v21  ;;  %1658 = vmatprep.subr.bf16.mxu1 %v2167_v22 }
  0x7f   :  { %1568 = vmatmul.mubr.bf16.vlgmr.msra.gmra.mrb[16].mxu0 %v2517_v26  ;;  %1609 = vmatmul.mubr.bf16.vlgmr.msra.gmra.mrb[16].mxu1 %v2517_v26 }
  0x80   :  { %1618 = vmatpush1.bf16.msra.mxu0 %v2162_v23  ;;  %1659 = vmatpush1.bf16.msra.mxu1 %v2165_v24 }
  0x81   :  { %1619 = vmatprep.subr.bf16.mxu0 %v2170_v25  ;;  %1660 = vmatprep.subr.bf16.mxu1 %v2173_v27 }
  0x82   :  { %1983 = vmatprep.mubr.msk.bf16.mxu0 %vm1409_vm2, %v2431_v58  ;;  %1984 = vmatprep.mubr.msk.bf16.mxu1 %vm1409_vm2, %v2431_v58  ;;  %v2185_v58 = vld [vmem:[%s2880_s4 + $0x14c] ss:$48 sps:$4 sm:$0xff]  }
  0x84   :  { %1620 = vmatpush1.bf16.msra.mxu0 %v2168_v28  ;;  %1661 = vmatpush1.bf16.msra.mxu1 %v2171_v29 }
  0x85   :  { %1621 = vmatprep.subr.bf16.mxu0 %v2176_v30  ;;  %1662 = vmatprep.subr.bf16.mxu1 %v2179_v31 }
  0x88   :  { %1622 = vmatpush1.bf16.msra.mxu0 %v2174_v32  ;;  %1663 = vmatpush1.bf16.msra.mxu1 %v2177_v33 }
  0x89   :  { %1623 = vmatprep.subr.bf16.mxu0 %v2182_v34  ;;  %1664 = vmatprep.subr.bf16.mxu1 %v2185_v58 }
  0x8c   :  { %1624 = vmatpush1.bf16.msra.mxu0 %v2180_v35  ;;  %1665 = vmatpush1.bf16.msra.mxu1 %v2183_v36 }
  0x8d   :  { %1625 = vmatprep.subr.bf16.mxu0 %v2188_v37  ;;  %1666 = vmatprep.subr.bf16.mxu1 %v2191_v38 }
  0x90   :  { %1626 = vmatpush1.bf16.msra.mxu0 %v2186_v39  ;;  %1667 = vmatpush1.bf16.msra.mxu1 %v2189_v41 }
  0x91   :  { %1627 = vmatprep.subr.bf16.mxu0 %v2194_v42  ;;  %1668 = vmatprep.subr.bf16.mxu1 %v2197_v43 }
  0x94   :  { %1628 = vmatpush1.bf16.msra.mxu0 %v2192_v44  ;;  %1669 = vmatpush1.bf16.msra.mxu1 %v2195_v45 }
  0x95   :  { %1629 = vmatprep.subr.bf16.mxu0 %v2200_v46  ;;  %1670 = vmatprep.subr.bf16.mxu1 %v2203_v47 }
  0x98   :  { %1630 = vmatpush1.bf16.msra.mxu0 %v2198_v48  ;;  %1671 = vmatpush1.bf16.msra.mxu1 %v2201_v49 }
  0x99   :  { %1631 = vmatprep.subr.bf16.mxu0 %v2206_v50  ;;  %1672 = vmatprep.subr.bf16.mxu1 %v2209_v51 }
  0x9c   :  { %1632 = vmatpush1.bf16.msra.mxu0 %v2204_v53  ;;  %1673 = vmatpush1.bf16.msra.mxu1 %v2207_v54 }
  0x9d   :  { %1633 = vmatprep.subr.bf16.mxu0 %v2212_v55  ;;  %1674 = vmatprep.subr.bf16.mxu1 %v2215_v56 }
  0xa0   :  { %1634 = vmatpush1.bf16.msra.mxu0 %v2210_v57  ;;  %1675 = vmatpush1.bf16.msra.mxu1 %v2213_v59 }
  0xa1   :  { %1635 = vmatprep.subr.bf16.mxu0 %v2218_v60  ;;  %1676 = vmatprep.subr.bf16.mxu1 %v2221_v61 }
  0xa4   :  { %1636 = vmatpush1.bf16.msra.mxu0 %v2216_v62  ;;  %1677 = vmatpush1.bf16.msra.mxu1 %v2219_v63 }
  0xa5   :  { %1637 = vmatprep.subr.bf16.mxu0 %v2224_v0  ;;  %1678 = vmatprep.subr.bf16.mxu1 %v2227_v1 }
  0xa8   :  { %1638 = vmatpush1.bf16.msra.mxu0 %v2222_v2  ;;  %1679 = vmatpush1.bf16.msra.mxu1 %v2225_v3 }
  0xa9   :  { %1639 = vmatprep.subr.bf16.mxu0 %v2230_v4  ;;  %1680 = vmatprep.subr.bf16.mxu1 %v2233_v5 }
  0xac   :  { %1640 = vmatpush1.bf16.msra.mxu0 %v2228_v8  ;;  %1681 = vmatpush1.bf16.msra.mxu1 %v2231_v9 }
  0xad   :  { %1641 = vmatprep.subr.bf16.mxu0 %v1445_v12  ;;  %1682 = vmatprep.subr.bf16.mxu1 %v1451_v13 }
  0xb0   :  { %1642 = vmatpush1.bf16.msra.mxu0 %v1442_v14  ;;  %1683 = vmatpush1.bf16.msra.mxu1 %v1448_v15 }
  0xb3   :  { %1650 = vmatmul.mubr.bf16.vlgmr.msra.gmra.mrb[20].mxu0 %v2517_v26  ;;  %1691 = vmatmul.mubr.bf16.vlgmr.msra.gmra.mrb[20].mxu1 %v2517_v26 }
  0xda   :  { %v159_v17 = vpop.f32.mrb[0].mxu0  ;;  %v200_v18 = vpop.f32.mrb[0].mxu1 }
  0xdb   :  { %v161_v19 = vpop.f32.mrb[1].mxu0  ;;  %v202_v20 = vpop.f32.mrb[1].mxu1 }
  0xdc   :  { %v383_v21 = vcombine.low %v159_v17, %v161_v19  ;;  %v384_v22 = vcombine.low %v200_v18, %v202_v20  ;;  %v163_v23 = vpop.f32.mrb[2].mxu0  ;;  %v204_v24 = vpop.f32.mrb[2].mxu1 }
  0xdd   :  { %v164_v25 = vpop.f32.mrb[3].mxu0  ;;  %v205_v27 = vpop.f32.mrb[3].mxu1  ;;  %v21_v23 = vld [vmem:[%s2882_s2] sm:$0xff] }
  0xde   :  { %v393_v16 = vrot.slane %v383_v21, %v2412_v52  ;;  %v400_v28 = vrot.slane %v384_v22, %v2412_v52 }
  0xe0   :  { %v415_v29 = vcombine.low %v393_v16, %v400_v28 }
  0xe2   :  { %v241_v30 = vpop.f32.mrb[4].mxu0  ;;  %v282_v31 = vpop.f32.mrb[4].mxu1  ;;  %v423_v42 = vrot.slane %v415_v29, %v2412_v52 }
  0xe3   :  { %v243_v32 = vpop.f32.mrb[5].mxu0  ;;  %v284_v33 = vpop.f32.mrb[5].mxu1 }
  0xe4   :  { %v385_v26 = vcombine.low %v241_v30, %v243_v32  ;;  %v386_v34 = vcombine.low %v282_v31, %v284_v33  ;;  %v245_v58 = vpop.f32.mrb[6].mxu0  ;;  %v286_v35 = vpop.f32.mrb[6].mxu1 }
  0xe5   :  { %v246_v36 = vpop.f32.mrb[7].mxu0  ;;  %v287_v37 = vpop.f32.mrb[7].mxu1 }
  0xe6   :  { %v407_v38 = vrot.slane %v385_v26, %v2412_v52  ;;  %v414_v39 = vrot.slane %v386_v34, %v2412_v52 }
  0xe8   :  { %v416_v41 = vcombine.low %v407_v38, %v414_v39 }
  0xea   :  { %v430_v43 = vrot.slane %v416_v41, %v2412_v52  ;;  %v323_v44 = vpop.f32.mrb[8].mxu0  ;;  %v364_v45 = vpop.f32.mrb[8].mxu1  ;;  %v22_v41 = vld [vmem:[%s2882_s2 + $0x8] sm:$0xf] }
  0xeb   :  { %v325_v46 = vpop.f32.mrb[9].mxu0  ;;  %v366_v47 = vpop.f32.mrb[9].mxu1 }
  0xec   :  { %v431_v48 = vcombine.low %v423_v42, %v430_v43  ;;  %v432_v49 = vcombine.low %v323_v44, %v325_v46  ;;  %v433_v50 = vcombine.low %v364_v45, %v366_v47  ;;  %v327_v51 = vpop.f32.mrb[10].mxu0  ;;  %v368_v53 = vpop.f32.mrb[10].mxu1 }
  0xed   :  { %v328_v54 = vpop.f32.mrb[11].mxu0  ;;  %v369_v55 = vpop.f32.mrb[11].mxu1 }
  0xee   :  { %v440_v56 = vrot.slane %v432_v49, %v2412_v52  ;;  %v447_v57 = vrot.slane %v433_v50, %v2412_v52  ;;  %v458_v27 = vadd.f32 %v431_v48, %v21_v23 }
  0xf0   :  { %v448_v59 = vcombine.low %v440_v56, %v447_v57 }
  0xf2   :  { %v455_v37 = vrot.slane %v448_v59, %v2412_v52 }
  0xf4   :  { %v459_v43 = vadd.f32 %v455_v37, %v22_v41 }
 0x11e   :  { %v1487_v60 = vpop.f32.mrb[12].mxu0  ;;  %v1528_v61 = vpop.f32.mrb[12].mxu1 }
 0x11f   :  { %v1489_v62 = vpop.f32.mrb[13].mxu0  ;;  %v1530_v63 = vpop.f32.mrb[13].mxu1 }
 0x120   :  { %v1711_v0 = vcombine.low %v1487_v60, %v1489_v62  ;;  %v1712_v1 = vcombine.low %v1528_v61, %v1530_v63  ;;  %v1491_v2 = vpop.f32.mrb[14].mxu0  ;;  %v1532_v3 = vpop.f32.mrb[14].mxu1 }
 0x121   :  { %v1492_v4 = vpop.f32.mrb[15].mxu0  ;;  %v1533_v5 = vpop.f32.mrb[15].mxu1 }
 0x122   :  { %v1721_v6 = vrot.slane %v1711_v0, %v2412_v52  ;;  %v1728_v7 = vrot.slane %v1712_v1, %v2412_v52 }
 0x124   :  { %v1743_v8 = vcombine.low %v1721_v6, %v1728_v7 }
 0x126   :  { %v1751_v24 = vrot.slane %v1743_v8, %v2412_v52 }
 0x152   :  { %v1569_v9 = vpop.f32.mrb[16].mxu0  ;;  %v1610_v10 = vpop.f32.mrb[16].mxu1 }
 0x153   :  { %v1571_v11 = vpop.f32.mrb[17].mxu0  ;;  %v1612_v12 = vpop.f32.mrb[17].mxu1 }
 0x154   :  { %v1713_v13 = vcombine.low %v1569_v9, %v1571_v11  ;;  %v1714_v14 = vcombine.low %v1610_v10, %v1612_v12  ;;  %v1573_v15 = vpop.f32.mrb[18].mxu0  ;;  %v1614_v17 = vpop.f32.mrb[18].mxu1 }
 0x155   :  { %v1574_v18 = vpop.f32.mrb[19].mxu0  ;;  %v1615_v19 = vpop.f32.mrb[19].mxu1 }
 0x156   :  { %v1735_v20 = vrot.slane %v1713_v13, %v2412_v52  ;;  %v1742_v21 = vrot.slane %v1714_v14, %v2412_v52 }
 0x158   :  { %v1744_v22 = vcombine.low %v1735_v20, %v1742_v21 }
 0x15a   :  { %v1758_v25 = vrot.slane %v1744_v22, %v2412_v52 }
 0x15c   :  { %v1759_v16 = vcombine.low %v1751_v24, %v1758_v25 }
 0x15e   :  { %v1786_v28 = vadd.f32 %v1759_v16, %v458_v27 }
 0x160   :  { %1788 = vst [vmem:[%s2883_s5] sm:$0xff] %v1786_v28 }
 0x186   :  { %v1651_v29 = vpop.f32.mrb[20].mxu0  ;;  %v1692_v30 = vpop.f32.mrb[20].mxu1 }
 0x187   :  { %v1653_v31 = vpop.f32.mrb[21].mxu0  ;;  %v1694_v32 = vpop.f32.mrb[21].mxu1 }
 0x188   :  { %v1760_v33 = vcombine.low %v1651_v29, %v1653_v31  ;;  %v1761_v26 = vcombine.low %v1692_v30, %v1694_v32  ;;  %v1655_v34 = vpop.f32.mrb[22].mxu0  ;;  %v1696_v58 = vpop.f32.mrb[22].mxu1 }
 0x189   :  { %v1656_v35 = vpop.f32.mrb[23].mxu0  ;;  %v1697_v36 = vpop.f32.mrb[23].mxu1 }
 0x18a   :  { %v1768_v38 = vrot.slane %v1760_v33, %v2412_v52  ;;  %v1775_v39 = vrot.slane %v1761_v26, %v2412_v52 }
 0x18c   :  { %v1776_v42 = vcombine.low %v1768_v38, %v1775_v39 }
 0x18e   :  { %v1783_v44 = vrot.slane %v1776_v42, %v2412_v52 }
 0x190   :  { %v1787_v45 = vadd.f32 %v1783_v44, %v459_v43 }
 0x192   :  { %1793 = vst.msk [vmem:[%s2883_s5 + $0x8] sm:$0xf] %vm1791_vm5, %v1787_v45 }

</bundles_post_ra>
